<compile_context>
chip_gen: v5e
topology: v5e:2x2
jax: 0.10.0
libtpu: 0.0.40
codegen_flags: <defaults>
</compile_context>

<pallas_src>
import functools
import math

import jax
import jax.numpy as jnp
from jax.experimental import pallas as pl
from jax.experimental.pallas import tpu as pltpu


def _layernorm(x, gamma, beta, eps=1e-5):
    # x: (N, D) f32; gamma/beta: (1, D) f32
    mean = jnp.mean(x, axis=-1, keepdims=True)
    xc = x - mean
    var = jnp.mean(xc * xc, axis=-1, keepdims=True)
    inv = jax.lax.rsqrt(var + eps)
    return xc * inv * gamma + beta


def _gelu_exact(x):
    # matches torch.nn.GELU() default (erf form)
    return 0.5 * x * (1.0 + jax.lax.erf(x * (1.0 / math.sqrt(2.0))))


def encoder_block_kernel(
    x_ref,                      # (1, N, D)   f32
    ln1_g, ln1_b,               # (1, D)      f32
    wq_ref, wk_ref, wv_ref,     # (H, D, hd)  bf16  (attn scale folded into wq)
    wproj_ref,                  # (H, hd, D)  bf16
    bproj_ref,                  # (1, D)      f32
    ln2_g, ln2_b,               # (1, D)      f32
    wfc1_ref, bfc1_ref,         # (D, Hid) bf16, (1, Hid) f32
    wfc2_ref, bfc2_ref,         # (Hid, D) bf16, (1, D)   f32
    o_ref,                      # (1, N, D)   f32
    *, num_heads,
):
    f32 = jnp.float32
    cdt = wq_ref.dtype          # matmul-input dtype (bf16)

    x = x_ref[0]                # (N, D) f32
    N, D = x.shape

    # ---------------- Attention branch: x + proj(MHSA(LN1(x))) ----------------
    xn = _layernorm(x, ln1_g[...], ln1_b[...]).astype(cdt)
    xh = jnp.broadcast_to(xn[None], (num_heads, N, D))          # (H, N, D), hoisted once

    q = jnp.einsum('hnd,hde->hne', xh, wq_ref[...],
                   preferred_element_type=f32)                   # (H, N, hd), pre-scaled
    k = jnp.einsum('hnd,hde->hne', xh, wk_ref[...],
                   preferred_element_type=f32)
    v = jnp.einsum('hnd,hde->hne', xh, wv_ref[...],
                   preferred_element_type=f32)

    scores = jnp.einsum('hqe,hke->hqk', q.astype(cdt), k.astype(cdt),
                        preferred_element_type=f32)              # (H, N, N)
    m = jnp.max(scores, axis=-1, keepdims=True)
    e = jnp.exp(scores - m)
    denom = jnp.sum(e, axis=-1, keepdims=True)
    p = e * pl.reciprocal(denom, approx=True)                    # EUP recip, frees VALU

    ctx = jnp.einsum('hqk,hke->hqe', p.astype(cdt), v.astype(cdt),
                     preferred_element_type=f32)                 # (H, N, hd)

    # Per-head projection summed over heads == transpose+concat+proj, without
    # any lane-axis shuffles.
    proj = jnp.einsum('hne,hed->hnd', ctx.astype(cdt), wproj_ref[...],
                      preferred_element_type=f32)                # (H, N, D)
    attn_out = jnp.sum(proj, axis=0) + bproj_ref[...]
    x = x + attn_out

    # ---------------- FFN branch: x + fc2(GELU(fc1(LN2(x)))) ----------------
    xn2 = _layernorm(x, ln2_g[...], ln2_b[...]).astype(cdt)
    h1 = jnp.dot(xn2, wfc1_ref[...], preferred_element_type=f32) + bfc1_ref[...]
    h1 = _gelu_exact(h1).astype(cdt)
    h2 = jnp.dot(h1, wfc2_ref[...], preferred_element_type=f32) + bfc2_ref[...]
    x = x + h2

    o_ref[0] = x.astype(o_ref.dtype)


def prepare_kernel_params(p, *, num_heads, compute_dtype=jnp.bfloat16):
    """Reorganize canonical params (torch Linear weights already transposed to
    (in, out)) into the head-batched bf16 layout the kernel consumes."""
    D = p["w_qkv"].shape[0]
    hd = D // num_heads
    scale = hd ** (-0.5)
    f32 = jnp.float32

    wq, wk, wv = jnp.split(p["w_qkv"], 3, axis=1)                # each (D, D)

    def heads_in(w):                                             # (D, D) -> (H, D, hd)
        return jnp.transpose(w.reshape(D, num_heads, hd), (1, 0, 2))

    return {
        "ln1_g": p["ln1_g"].astype(f32), "ln1_b": p["ln1_b"].astype(f32),
        "w_q": (heads_in(wq) * scale).astype(compute_dtype),     # scale folded in
        "w_k": heads_in(wk).astype(compute_dtype),
        "w_v": heads_in(wv).astype(compute_dtype),
        "w_proj": p["w_proj"].reshape(num_heads, hd, D).astype(compute_dtype),
        "b_proj": p["b_proj"].astype(f32),
        "ln2_g": p["ln2_g"].astype(f32), "ln2_b": p["ln2_b"].astype(f32),
        "w_fc1": p["w_fc1"].astype(compute_dtype),
        "b_fc1": p["b_fc1"].astype(f32),
        "w_fc2": p["w_fc2"].astype(compute_dtype),
        "b_fc2": p["b_fc2"].astype(f32),
    }


def encoder_block(x, kp, *, num_heads, single_buffer_weights=True):
    B, N, D = x.shape
    hd = D // num_heads
    Hid = kp["w_fc1"].shape[1]

    pm = pl.Buffered(1) if single_buffer_weights else None

    def const_spec(shape):
        n = len(shape)
        idx = lambda b, n=n: (0,) * n
        if pm is None:
            return pl.BlockSpec(shape, idx)
        return pl.BlockSpec(shape, idx, pipeline_mode=pm)

    in_specs = [
        pl.BlockSpec((1, N, D), lambda b: (b, 0, 0)),            # x (double-buffered)
        const_spec((1, D)), const_spec((1, D)),                  # ln1 gamma/beta
        const_spec((num_heads, D, hd)),                          # w_q (pre-scaled)
        const_spec((num_heads, D, hd)),                          # w_k
        const_spec((num_heads, D, hd)),                          # w_v
        const_spec((num_heads, hd, D)),                          # w_proj
        const_spec((1, D)),                                      # b_proj
        const_spec((1, D)), const_spec((1, D)),                  # ln2 gamma/beta
        const_spec((D, Hid)), const_spec((1, Hid)),              # fc1 w/b
        const_spec((Hid, D)), const_spec((1, D)),                # fc2 w/b
    ]

    # --- VMEM budget (weights + double-buffered io tiles + activations), 25% headroom,
    #     clamped so it also fits v7x's 64 MiB physical VMEM. ---
    weight_bytes = sum(int(v.size) * v.dtype.itemsize for v in kp.values())
    io_bytes = 2 * 2 * N * D * 4
    act_bytes = 4 * (3 * num_heads * N * hd        # q, k, v
                     + 2 * num_heads * N * N       # scores + probs
                     + num_heads * N * D           # per-head projections
                     + 2 * N * Hid + 4 * N * D)    # ffn + ln / residual temps
    vmem_bytes = int(1.25 * (weight_bytes * (1 if single_buffer_weights else 2)
                             + io_bytes + act_bytes))
    vmem_bytes = min(max(vmem_bytes, 32 * 1024 * 1024), 64 * 1024 * 1024)

    flops = 2 * B * N * (3 * D * D + 2 * N * D + D * D + 2 * D * Hid)
    transcendentals = B * (num_heads * N * N + N * Hid + 4 * N)
    bytes_accessed = 2 * B * N * D * 4 + weight_bytes

    kernel = functools.partial(encoder_block_kernel, num_heads=num_heads)

    return pl.pallas_call(
        kernel,
        out_shape=jax.ShapeDtypeStruct((B, N, D), jnp.float32),
        grid_spec=pltpu.PrefetchScalarGridSpec(
            num_scalar_prefetch=0,
            grid=(B,),
            in_specs=in_specs,
            out_specs=pl.BlockSpec((1, N, D), lambda b: (b, 0, 0)),
        ),
        compiler_params=pltpu.CompilerParams(
            dimension_semantics=("parallel",),
            vmem_limit_bytes=vmem_bytes),
        cost_estimate=pl.CostEstimate(
            flops=flops, transcendentals=transcendentals,
            bytes_accessed=bytes_accessed),
    )(
        x,
        kp["ln1_g"], kp["ln1_b"],
        kp["w_q"], kp["w_k"], kp["w_v"],
        kp["w_proj"], kp["b_proj"],
        kp["ln2_g"], kp["ln2_b"],
        kp["w_fc1"], kp["b_fc1"],
        kp["w_fc2"], kp["b_fc2"],
    )


def run_encoder_block(x, kp, *, num_heads):
    # Prefer single-buffered weight BlockSpecs (their index_map is constant, so
    # double buffering only wastes VMEM). Fall back transparently if this JAX
    # build does not accept pipeline_mode on pallas_call BlockSpecs.
    try:
        out = encoder_block(x, kp, num_heads=num_heads, single_buffer_weights=True)
        return jax.block_until_ready(out)
    except Exception:
        out = encoder_block(x, kp, num_heads=num_heads, single_buffer_weights=False)
        return jax.block_until_ready(out)


def reference_encoder_block(x, params, *, num_heads):
    # Pure-JAX f32 reference mirroring the PyTorch forward (dropout = identity).
    B, N, D = x.shape
    hd = D // num_heads
    scale = hd ** (-0.5)

    def ln(v, g, b):
        m = jnp.mean(v, -1, keepdims=True)
        var = jnp.mean((v - m) ** 2, -1, keepdims=True)
        return (v - m) / jnp.sqrt(var + 1e-5) * g + b

    xn = ln(x, params["ln1_g"], params["ln1_b"])
    qkv = xn @ params["w_qkv"]                                    # (B, N, 3D)
    qkv = qkv.reshape(B, N, 3, num_heads, hd).transpose(2, 0, 3, 1, 4)
    q, k, v = qkv[0], qkv[1], qkv[2]                              # (B, H, N, hd)
    attn = jnp.einsum("bhnd,bhmd->bhnm", q, k) * scale
    attn = jax.nn.softmax(attn, axis=-1)
    o = jnp.einsum("bhnm,bhmd->bhnd", attn, v)
    o = o.transpose(0, 2, 1, 3).reshape(B, N, D)
    o = o @ params["w_proj"] + params["b_proj"]
    x = x + o

    xn2 = ln(x, params["ln2_g"], params["ln2_b"])
    h1 = jax.nn.gelu(xn2 @ params["w_fc1"] + params["b_fc1"], approximate=False)
    h2 = h1 @ params["w_fc2"] + params["b_fc2"]
    return x + h2


def init_params(key, dim, mlp_ratio=4.0):
    hidden = int(dim * mlp_ratio)
    ks = jax.random.split(key, 6)
    std = 0.02
    return {
        "ln1_g": jnp.ones((1, dim), jnp.float32),
        "ln1_b": jnp.zeros((1, dim), jnp.float32),
        "w_qkv": std * jax.random.normal(ks[0], (dim, 3 * dim), jnp.float32),
        "w_proj": std * jax.random.normal(ks[1], (dim, dim), jnp.float32),
        "b_proj": std * jax.random.normal(ks[2], (1, dim), jnp.float32),
        "ln2_g": jnp.ones((1, dim), jnp.float32),
        "ln2_b": jnp.zeros((1, dim), jnp.float32),
        "w_fc1": std * jax.random.normal(ks[3], (dim, hidden), jnp.float32),
        "b_fc1": jnp.zeros((1, hidden), jnp.float32),
        "w_fc2": std * jax.random.normal(ks[4], (hidden, dim), jnp.float32),
        "b_fc2": jnp.zeros((1, dim), jnp.float32),
    }


if __name__ == "__main__":
    B, N, D = 2, 8, 32          # batch, patch_number, patch_dim
    num_heads = 4
    key = jax.random.PRNGKey(0)
    kx, kparams_key = jax.random.split(key)
    x = jax.random.normal(kx, (B, N, D), jnp.float32)
    params = init_params(kparams_key, D, mlp_ratio=4.0)
    kparams = prepare_kernel_params(params, num_heads=num_heads)

    out = run_encoder_block(x, kparams, num_heads=num_heads)

    ref = reference_encoder_block(x, params, num_heads=num_heads)
    assert out.shape == (B, N, D)
    err = float(jnp.max(jnp.abs(out - ref)))
    # bf16 matmul inputs + approx reciprocal -> loosened tolerance vs f32 reference.
    assert err < 2e-2, err
    print("KERNEL_OK")
</pallas_src>

<mosaic_0001>
module attributes {stable_mosaic.version = 11 : i64} {
  func.func @encoder_block_kernel(%arg0: i32, %arg1: memref<1x8x32xf32, #tpu.memory_space<vmem>>, %arg2: memref<1x32xf32, #tpu.memory_space<vmem>>, %arg3: memref<1x32xf32, #tpu.memory_space<vmem>>, %arg4: memref<4x32x8xbf16, #tpu.memory_space<vmem>>, %arg5: memref<4x32x8xbf16, #tpu.memory_space<vmem>>, %arg6: memref<4x32x8xbf16, #tpu.memory_space<vmem>>, %arg7: memref<4x8x32xbf16, #tpu.memory_space<vmem>>, %arg8: memref<1x32xf32, #tpu.memory_space<vmem>>, %arg9: memref<1x32xf32, #tpu.memory_space<vmem>>, %arg10: memref<1x32xf32, #tpu.memory_space<vmem>>, %arg11: memref<32x128xbf16, #tpu.memory_space<vmem>>, %arg12: memref<1x128xf32, #tpu.memory_space<vmem>>, %arg13: memref<128x32xbf16, #tpu.memory_space<vmem>>, %arg14: memref<1x32xf32, #tpu.memory_space<vmem>>, %arg15: memref<1x8x32xf32, #tpu.memory_space<vmem>>) attributes {dimension_semantics = [#tpu.dimension_semantics<parallel>], iteration_bounds = array<i64: 2>, scalar_prefetch = 0 : i64, scratch_operands = 0 : i64, tpu.core_type = #tpu.core_type<tc>, window_params = [{transform_indices = @transform_0, window_bounds = array<i64: 1, 8, 32>}, {pipeline_mode = #tpu.pipeline_mode<synchronous>, transform_indices = @transform_1, window_bounds = array<i64: 1, 32>}, {pipeline_mode = #tpu.pipeline_mode<synchronous>, transform_indices = @transform_2, window_bounds = array<i64: 1, 32>}, {pipeline_mode = #tpu.pipeline_mode<synchronous>, transform_indices = @transform_3, window_bounds = array<i64: 4, 32, 8>}, {pipeline_mode = #tpu.pipeline_mode<synchronous>, transform_indices = @transform_4, window_bounds = array<i64: 4, 32, 8>}, {pipeline_mode = #tpu.pipeline_mode<synchronous>, transform_indices = @transform_5, window_bounds = array<i64: 4, 32, 8>}, {pipeline_mode = #tpu.pipeline_mode<synchronous>, transform_indices = @transform_6, window_bounds = array<i64: 4, 8, 32>}, {pipeline_mode = #tpu.pipeline_mode<synchronous>, transform_indices = @transform_7, window_bounds = array<i64: 1, 32>}, {pipeline_mode = #tpu.pipeline_mode<synchronous>, transform_indices = @transform_8, window_bounds = array<i64: 1, 32>}, {pipeline_mode = #tpu.pipeline_mode<synchronous>, transform_indices = @transform_9, window_bounds = array<i64: 1, 32>}, {pipeline_mode = #tpu.pipeline_mode<synchronous>, transform_indices = @transform_10, window_bounds = array<i64: 32, 128>}, {pipeline_mode = #tpu.pipeline_mode<synchronous>, transform_indices = @transform_11, window_bounds = array<i64: 1, 128>}, {pipeline_mode = #tpu.pipeline_mode<synchronous>, transform_indices = @transform_12, window_bounds = array<i64: 128, 32>}, {pipeline_mode = #tpu.pipeline_mode<synchronous>, transform_indices = @transform_13, window_bounds = array<i64: 1, 32>}, {transform_indices = @transform_14, window_bounds = array<i64: 1, 8, 32>}]} {
    %c0 = arith.constant 0 : index
    %c0_0 = arith.constant 0 : index
    %c0_1 = arith.constant 0 : index
    %0 = vector.load %arg1[%c0, %c0_0, %c0_1] : memref<1x8x32xf32, #tpu.memory_space<vmem>>, vector<1x8x32xf32>
    %1 = vector.shape_cast %0 : vector<1x8x32xf32> to vector<8x32xf32>
    %c0_2 = arith.constant 0 : index
    %c0_3 = arith.constant 0 : index
    %2 = vector.load %arg2[%c0_2, %c0_3] : memref<1x32xf32, #tpu.memory_space<vmem>>, vector<1x32xf32>
    %c0_4 = arith.constant 0 : index
    %c0_5 = arith.constant 0 : index
    %3 = vector.load %arg3[%c0_4, %c0_5] : memref<1x32xf32, #tpu.memory_space<vmem>>, vector<1x32xf32>
    %cst = arith.constant dense<0.000000e+00> : vector<8xf32>
    %4 = vector.multi_reduction <add>, %1, %cst [1] : vector<8x32xf32> to vector<8xf32>
    %5 = vector.shape_cast %4 : vector<8xf32> to vector<8x1xf32>
    %cst_6 = arith.constant 3.200000e+01 : f32
    %6 = vector.broadcast %cst_6 : f32 to vector<8x1xf32>
    %7 = arith.divf %5, %6 : vector<8x1xf32>
    %8 = vector.broadcast %7 : vector<8x1xf32> to vector<8x32xf32>
    %9 = arith.subf %1, %8 : vector<8x32xf32>
    %10 = arith.mulf %9, %9 : vector<8x32xf32>
    %cst_7 = arith.constant dense<0.000000e+00> : vector<8xf32>
    %11 = vector.multi_reduction <add>, %10, %cst_7 [1] : vector<8x32xf32> to vector<8xf32>
    %12 = vector.shape_cast %11 : vector<8xf32> to vector<8x1xf32>
    %cst_8 = arith.constant 3.200000e+01 : f32
    %13 = vector.broadcast %cst_8 : f32 to vector<8x1xf32>
    %14 = arith.divf %12, %13 : vector<8x1xf32>
    %cst_9 = arith.constant 9.99999974E-6 : f32
    %15 = vector.broadcast %cst_9 : f32 to vector<8x1xf32>
    %16 = arith.addf %14, %15 : vector<8x1xf32>
    %17 = math.rsqrt %16 : vector<8x1xf32>
    %18 = vector.broadcast %17 : vector<8x1xf32> to vector<8x32xf32>
    %19 = arith.mulf %9, %18 : vector<8x32xf32>
    %20 = vector.broadcast %2 : vector<1x32xf32> to vector<8x32xf32>
    %21 = arith.mulf %19, %20 : vector<8x32xf32>
    %22 = vector.broadcast %3 : vector<1x32xf32> to vector<8x32xf32>
    %23 = arith.addf %21, %22 : vector<8x32xf32>
    %24 = arith.truncf %23 : vector<8x32xf32> to vector<8x32xbf16>
    %25 = vector.shape_cast %24 : vector<8x32xbf16> to vector<1x8x32xbf16>
    %26 = vector.shape_cast %25 : vector<1x8x32xbf16> to vector<1x8x32xbf16>
    %27 = vector.broadcast %26 : vector<1x8x32xbf16> to vector<4x8x32xbf16>
    %c0_10 = arith.constant 0 : index
    %c0_11 = arith.constant 0 : index
    %c0_12 = arith.constant 0 : index
    %28 = vector.load %arg4[%c0_10, %c0_11, %c0_12] : memref<4x32x8xbf16, #tpu.memory_space<vmem>>, vector<4x32x8xbf16>
    "tpu.trace_start"() <{level = 10 : i32, message = "hnd,hde->hne"}> : () -> ()
    %cst_13 = arith.constant dense<0.000000e+00> : vector<4x8x8xf32>
    %29 = tpu.matmul %27, %28, %cst_13 {dimension_numbers = #tpu.dot_dimension_numbers<[2], [1], [1], [2], [0, 0, 0, 1, 1, 2], [0], [0]>} : vector<4x8x32xbf16>, vector<4x32x8xbf16>, vector<4x8x8xf32> -> vector<4x8x8xf32>
    "tpu.trace_stop"() : () -> ()
    %c0_14 = arith.constant 0 : index
    %c0_15 = arith.constant 0 : index
    %c0_16 = arith.constant 0 : index
    %30 = vector.load %arg5[%c0_14, %c0_15, %c0_16] : memref<4x32x8xbf16, #tpu.memory_space<vmem>>, vector<4x32x8xbf16>
    "tpu.trace_start"() <{level = 10 : i32, message = "hnd,hde->hne"}> : () -> ()
    %cst_17 = arith.constant dense<0.000000e+00> : vector<4x8x8xf32>
    %31 = tpu.matmul %27, %30, %cst_17 {dimension_numbers = #tpu.dot_dimension_numbers<[2], [1], [1], [2], [0, 0, 0, 1, 1, 2], [0], [0]>} : vector<4x8x32xbf16>, vector<4x32x8xbf16>, vector<4x8x8xf32> -> vector<4x8x8xf32>
    "tpu.trace_stop"() : () -> ()
    %c0_18 = arith.constant 0 : index
    %c0_19 = arith.constant 0 : index
    %c0_20 = arith.constant 0 : index
    %32 = vector.load %arg6[%c0_18, %c0_19, %c0_20] : memref<4x32x8xbf16, #tpu.memory_space<vmem>>, vector<4x32x8xbf16>
    "tpu.trace_start"() <{level = 10 : i32, message = "hnd,hde->hne"}> : () -> ()
    %cst_21 = arith.constant dense<0.000000e+00> : vector<4x8x8xf32>
    %33 = tpu.matmul %27, %32, %cst_21 {dimension_numbers = #tpu.dot_dimension_numbers<[2], [1], [1], [2], [0, 0, 0, 1, 1, 2], [0], [0]>} : vector<4x8x32xbf16>, vector<4x32x8xbf16>, vector<4x8x8xf32> -> vector<4x8x8xf32>
    "tpu.trace_stop"() : () -> ()
    %34 = arith.truncf %29 : vector<4x8x8xf32> to vector<4x8x8xbf16>
    %35 = arith.truncf %31 : vector<4x8x8xf32> to vector<4x8x8xbf16>
    "tpu.trace_start"() <{level = 10 : i32, message = "hqe,hke->hqk"}> : () -> ()
    %cst_22 = arith.constant dense<0.000000e+00> : vector<4x8x8xf32>
    %36 = tpu.matmul %34, %35, %cst_22 {dimension_numbers = #tpu.dot_dimension_numbers<[2], [2], [1], [1], [0, 0, 0, 1, 1, 1], [0], [0]>} : vector<4x8x8xbf16>, vector<4x8x8xbf16>, vector<4x8x8xf32> -> vector<4x8x8xf32>
    "tpu.trace_stop"() : () -> ()
    %cst_23 = arith.constant dense<0xFF800000> : vector<4x8xf32>
    %37 = vector.multi_reduction <maximumf>, %36, %cst_23 [2] : vector<4x8x8xf32> to vector<4x8xf32>
    %38 = vector.shape_cast %37 : vector<4x8xf32> to vector<4x8x1xf32>
    %39 = vector.broadcast %38 : vector<4x8x1xf32> to vector<4x8x8xf32>
    %40 = arith.subf %36, %39 : vector<4x8x8xf32>
    %41 = math.exp %40 : vector<4x8x8xf32>
    %cst_24 = arith.constant dense<0.000000e+00> : vector<4x8xf32>
    %42 = vector.multi_reduction <add>, %41, %cst_24 [2] : vector<4x8x8xf32> to vector<4x8xf32>
    %43 = vector.shape_cast %42 : vector<4x8xf32> to vector<4x8x1xf32>
    %44 = tpu.reciprocal %43 {approx = true} : vector<4x8x1xf32> -> vector<4x8x1xf32>
    %45 = vector.broadcast %44 : vector<4x8x1xf32> to vector<4x8x8xf32>
    %46 = arith.mulf %41, %45 : vector<4x8x8xf32>
    %47 = arith.truncf %46 : vector<4x8x8xf32> to vector<4x8x8xbf16>
    %48 = arith.truncf %33 : vector<4x8x8xf32> to vector<4x8x8xbf16>
    "tpu.trace_start"() <{level = 10 : i32, message = "hqk,hke->hqe"}> : () -> ()
    %cst_25 = arith.constant dense<0.000000e+00> : vector<4x8x8xf32>
    %49 = tpu.matmul %47, %48, %cst_25 {dimension_numbers = #tpu.dot_dimension_numbers<[2], [1], [1], [2], [0, 0, 0, 1, 1, 2], [0], [0]>} : vector<4x8x8xbf16>, vector<4x8x8xbf16>, vector<4x8x8xf32> -> vector<4x8x8xf32>
    "tpu.trace_stop"() : () -> ()
    %50 = arith.truncf %49 : vector<4x8x8xf32> to vector<4x8x8xbf16>
    %c0_26 = arith.constant 0 : index
    %c0_27 = arith.constant 0 : index
    %c0_28 = arith.constant 0 : index
    %51 = vector.load %arg7[%c0_26, %c0_27, %c0_28] : memref<4x8x32xbf16, #tpu.memory_space<vmem>>, vector<4x8x32xbf16>
    "tpu.trace_start"() <{level = 10 : i32, message = "hne,hed->hnd"}> : () -> ()
    %cst_29 = arith.constant dense<0.000000e+00> : vector<4x8x32xf32>
    %52 = tpu.matmul %50, %51, %cst_29 {dimension_numbers = #tpu.dot_dimension_numbers<[2], [1], [1], [2], [0, 0, 0, 1, 1, 2], [0], [0]>} : vector<4x8x8xbf16>, vector<4x8x32xbf16>, vector<4x8x32xf32> -> vector<4x8x32xf32>
    "tpu.trace_stop"() : () -> ()
    %cst_30 = arith.constant dense<0.000000e+00> : vector<8x32xf32>
    %53 = vector.multi_reduction <add>, %52, %cst_30 [0] : vector<4x8x32xf32> to vector<8x32xf32>
    %c0_31 = arith.constant 0 : index
    %c0_32 = arith.constant 0 : index
    %54 = vector.load %arg8[%c0_31, %c0_32] : memref<1x32xf32, #tpu.memory_space<vmem>>, vector<1x32xf32>
    %55 = vector.broadcast %54 : vector<1x32xf32> to vector<8x32xf32>
    %56 = arith.addf %53, %55 : vector<8x32xf32>
    %57 = arith.addf %1, %56 : vector<8x32xf32>
    %c0_33 = arith.constant 0 : index
    %c0_34 = arith.constant 0 : index
    %58 = vector.load %arg9[%c0_33, %c0_34] : memref<1x32xf32, #tpu.memory_space<vmem>>, vector<1x32xf32>
    %c0_35 = arith.constant 0 : index
    %c0_36 = arith.constant 0 : index
    %59 = vector.load %arg10[%c0_35, %c0_36] : memref<1x32xf32, #tpu.memory_space<vmem>>, vector<1x32xf32>
    %cst_37 = arith.constant dense<0.000000e+00> : vector<8xf32>
    %60 = vector.multi_reduction <add>, %57, %cst_37 [1] : vector<8x32xf32> to vector<8xf32>
    %61 = vector.shape_cast %60 : vector<8xf32> to vector<8x1xf32>
    %cst_38 = arith.constant 3.200000e+01 : f32
    %62 = vector.broadcast %cst_38 : f32 to vector<8x1xf32>
    %63 = arith.divf %61, %62 : vector<8x1xf32>
    %64 = vector.broadcast %63 : vector<8x1xf32> to vector<8x32xf32>
    %65 = arith.subf %57, %64 : vector<8x32xf32>
    %66 = arith.mulf %65, %65 : vector<8x32xf32>
    %cst_39 = arith.constant dense<0.000000e+00> : vector<8xf32>
    %67 = vector.multi_reduction <add>, %66, %cst_39 [1] : vector<8x32xf32> to vector<8xf32>
    %68 = vector.shape_cast %67 : vector<8xf32> to vector<8x1xf32>
    %cst_40 = arith.constant 3.200000e+01 : f32
    %69 = vector.broadcast %cst_40 : f32 to vector<8x1xf32>
    %70 = arith.divf %68, %69 : vector<8x1xf32>
    %cst_41 = arith.constant 9.99999974E-6 : f32
    %71 = vector.broadcast %cst_41 : f32 to vector<8x1xf32>
    %72 = arith.addf %70, %71 : vector<8x1xf32>
    %73 = math.rsqrt %72 : vector<8x1xf32>
    %74 = vector.broadcast %73 : vector<8x1xf32> to vector<8x32xf32>
    %75 = arith.mulf %65, %74 : vector<8x32xf32>
    %76 = vector.broadcast %58 : vector<1x32xf32> to vector<8x32xf32>
    %77 = arith.mulf %75, %76 : vector<8x32xf32>
    %78 = vector.broadcast %59 : vector<1x32xf32> to vector<8x32xf32>
    %79 = arith.addf %77, %78 : vector<8x32xf32>
    %80 = arith.truncf %79 : vector<8x32xf32> to vector<8x32xbf16>
    %c0_42 = arith.constant 0 : index
    %c0_43 = arith.constant 0 : index
    %81 = vector.load %arg11[%c0_42, %c0_43] : memref<32x128xbf16, #tpu.memory_space<vmem>>, vector<32x128xbf16>
    %cst_44 = arith.constant dense<0.000000e+00> : vector<8x128xf32>
    %82 = tpu.matmul %80, %81, %cst_44 {dimension_numbers = #tpu.dot_dimension_numbers<[1], [0], [0], [1], [0, 0, 1, 1], [], []>} : vector<8x32xbf16>, vector<32x128xbf16>, vector<8x128xf32> -> vector<8x128xf32>
    %c0_45 = arith.constant 0 : index
    %c0_46 = arith.constant 0 : index
    %83 = vector.load %arg12[%c0_45, %c0_46] : memref<1x128xf32, #tpu.memory_space<vmem>>, vector<1x128xf32>
    %84 = vector.broadcast %83 : vector<1x128xf32> to vector<8x128xf32>
    %85 = arith.addf %82, %84 : vector<8x128xf32>
    %cst_47 = arith.constant 5.000000e-01 : f32
    %86 = vector.broadcast %cst_47 : f32 to vector<8x128xf32>
    %87 = arith.mulf %86, %85 : vector<8x128xf32>
    %cst_48 = arith.constant 0.707106769 : f32
    %88 = vector.broadcast %cst_48 : f32 to vector<8x128xf32>
    %89 = arith.mulf %85, %88 : vector<8x128xf32>
    %90 = math.erf %89 : vector<8x128xf32>
    %cst_49 = arith.constant 1.000000e+00 : f32
    %91 = vector.broadcast %cst_49 : f32 to vector<8x128xf32>
    %92 = arith.addf %91, %90 : vector<8x128xf32>
    %93 = arith.mulf %87, %92 : vector<8x128xf32>
    %94 = arith.truncf %93 : vector<8x128xf32> to vector<8x128xbf16>
    %c0_50 = arith.constant 0 : index
    %c0_51 = arith.constant 0 : index
    %95 = vector.load %arg13[%c0_50, %c0_51] : memref<128x32xbf16, #tpu.memory_space<vmem>>, vector<128x32xbf16>
    %cst_52 = arith.constant dense<0.000000e+00> : vector<8x32xf32>
    %96 = tpu.matmul %94, %95, %cst_52 {dimension_numbers = #tpu.dot_dimension_numbers<[1], [0], [0], [1], [0, 0, 1, 1], [], []>} : vector<8x128xbf16>, vector<128x32xbf16>, vector<8x32xf32> -> vector<8x32xf32>
    %c0_53 = arith.constant 0 : index
    %c0_54 = arith.constant 0 : index
    %97 = vector.load %arg14[%c0_53, %c0_54] : memref<1x32xf32, #tpu.memory_space<vmem>>, vector<1x32xf32>
    %98 = vector.broadcast %97 : vector<1x32xf32> to vector<8x32xf32>
    %99 = arith.addf %96, %98 : vector<8x32xf32>
    %100 = arith.addf %57, %99 : vector<8x32xf32>
    %c0_55 = arith.constant 0 : index
    %c0_56 = arith.constant 0 : index
    %c0_57 = arith.constant 0 : index
    %101 = vector.load %arg15[%c0_55, %c0_56, %c0_57] : memref<1x8x32xf32, #tpu.memory_space<vmem>>, vector<1x8x32xf32>
    %102 = vector.shape_cast %101 : vector<1x8x32xf32> to vector<8x32xf32>
    %103 = vector.shape_cast %100 : vector<8x32xf32> to vector<1x8x32xf32>
    tpu.vector_store %arg15[%c0_55, %c0_56, %c0_57], %103 {strides = array<i32>} : memref<1x8x32xf32, #tpu.memory_space<vmem>>, vector<1x8x32xf32>,
    return
  }
  func.func @transform_0(%arg0: i32) -> (i32, i32, i32) {
    %c0_i32 = arith.constant 0 : i32
    %c0_i32_0 = arith.constant 0 : i32
    %c0_i32_1 = arith.constant 0 : i32
    return %arg0, %c0_i32, %c0_i32_0 : i32, i32, i32
  }
  func.func @transform_1(%arg0: i32) -> (i32, i32) {
    %c0_i32 = arith.constant 0 : i32
    %c0_i32_0 = arith.constant 0 : i32
    %c0_i32_1 = arith.constant 0 : i32
    return %c0_i32, %c0_i32_0 : i32, i32
  }
  func.func @transform_2(%arg0: i32) -> (i32, i32) {
    %c0_i32 = arith.constant 0 : i32
    %c0_i32_0 = arith.constant 0 : i32
    %c0_i32_1 = arith.constant 0 : i32
    return %c0_i32, %c0_i32_0 : i32, i32
  }
  func.func @transform_3(%arg0: i32) -> (i32, i32, i32) {
    %c0_i32 = arith.constant 0 : i32
    %c0_i32_0 = arith.constant 0 : i32
    %c0_i32_1 = arith.constant 0 : i32
    %c0_i32_2 = arith.constant 0 : i32
    return %c0_i32, %c0_i32_0, %c0_i32_1 : i32, i32, i32
  }
  func.func @transform_4(%arg0: i32) -> (i32, i32, i32) {
    %c0_i32 = arith.constant 0 : i32
    %c0_i32_0 = arith.constant 0 : i32
    %c0_i32_1 = arith.constant 0 : i32
    %c0_i32_2 = arith.constant 0 : i32
    return %c0_i32, %c0_i32_0, %c0_i32_1 : i32, i32, i32
  }
  func.func @transform_5(%arg0: i32) -> (i32, i32, i32) {
    %c0_i32 = arith.constant 0 : i32
    %c0_i32_0 = arith.constant 0 : i32
    %c0_i32_1 = arith.constant 0 : i32
    %c0_i32_2 = arith.constant 0 : i32
    return %c0_i32, %c0_i32_0, %c0_i32_1 : i32, i32, i32
  }
  func.func @transform_6(%arg0: i32) -> (i32, i32, i32) {
    %c0_i32 = arith.constant 0 : i32
    %c0_i32_0 = arith.constant 0 : i32
    %c0_i32_1 = arith.constant 0 : i32
    %c0_i32_2 = arith.constant 0 : i32
    return %c0_i32, %c0_i32_0, %c0_i32_1 : i32, i32, i32
  }
  func.func @transform_7(%arg0: i32) -> (i32, i32) {
    %c0_i32 = arith.constant 0 : i32
    %c0_i32_0 = arith.constant 0 : i32
    %c0_i32_1 = arith.constant 0 : i32
    return %c0_i32, %c0_i32_0 : i32, i32
  }
  func.func @transform_8(%arg0: i32) -> (i32, i32) {
    %c0_i32 = arith.constant 0 : i32
    %c0_i32_0 = arith.constant 0 : i32
    %c0_i32_1 = arith.constant 0 : i32
    return %c0_i32, %c0_i32_0 : i32, i32
  }
  func.func @transform_9(%arg0: i32) -> (i32, i32) {
    %c0_i32 = arith.constant 0 : i32
    %c0_i32_0 = arith.constant 0 : i32
    %c0_i32_1 = arith.constant 0 : i32
    return %c0_i32, %c0_i32_0 : i32, i32
  }
  func.func @transform_10(%arg0: i32) -> (i32, i32) {
    %c0_i32 = arith.constant 0 : i32
    %c0_i32_0 = arith.constant 0 : i32
    %c0_i32_1 = arith.constant 0 : i32
    return %c0_i32, %c0_i32_0 : i32, i32
  }
  func.func @transform_11(%arg0: i32) -> (i32, i32) {
    %c0_i32 = arith.constant 0 : i32
    %c0_i32_0 = arith.constant 0 : i32
    %c0_i32_1 = arith.constant 0 : i32
    return %c0_i32, %c0_i32_0 : i32, i32
  }
  func.func @transform_12(%arg0: i32) -> (i32, i32) {
    %c0_i32 = arith.constant 0 : i32
    %c0_i32_0 = arith.constant 0 : i32
    %c0_i32_1 = arith.constant 0 : i32
    return %c0_i32, %c0_i32_0 : i32, i32
  }
  func.func @transform_13(%arg0: i32) -> (i32, i32) {
    %c0_i32 = arith.constant 0 : i32
    %c0_i32_0 = arith.constant 0 : i32
    %c0_i32_1 = arith.constant 0 : i32
    return %c0_i32, %c0_i32_0 : i32, i32
  }
  func.func @transform_14(%arg0: i32) -> (i32, i32, i32) {
    %c0_i32 = arith.constant 0 : i32
    %c0_i32_0 = arith.constant 0 : i32
    %c0_i32_1 = arith.constant 0 : i32
    return %arg0, %c0_i32, %c0_i32_0 : i32, i32, i32
  }
}

module attributes {stable_mosaic.version = 11 : i64} {
  func.func @encoder_block_kernel(%arg0: i32, %arg1: memref<1x8x32xf32, #tpu.memory_space<vmem>>, %arg2: memref<1x32xf32, #tpu.memory_space<vmem>>, %arg3: memref<1x32xf32, #tpu.memory_space<vmem>>, %arg4: memref<4x32x8xbf16, #tpu.memory_space<vmem>>, %arg5: memref<4x32x8xbf16, #tpu.memory_space<vmem>>, %arg6: memref<4x32x8xbf16, #tpu.memory_space<vmem>>, %arg7: memref<4x8x32xbf16, #tpu.memory_space<vmem>>, %arg8: memref<1x32xf32, #tpu.memory_space<vmem>>, %arg9: memref<1x32xf32, #tpu.memory_space<vmem>>, %arg10: memref<1x32xf32, #tpu.memory_space<vmem>>, %arg11: memref<32x128xbf16, #tpu.memory_space<vmem>>, %arg12: memref<1x128xf32, #tpu.memory_space<vmem>>, %arg13: memref<128x32xbf16, #tpu.memory_space<vmem>>, %arg14: memref<1x32xf32, #tpu.memory_space<vmem>>, %arg15: memref<1x8x32xf32, #tpu.memory_space<vmem>>) attributes {dimension_semantics = [#tpu.dimension_semantics<parallel>], iteration_bounds = array<i64: 2>, scalar_prefetch = 0 : i64, scratch_operands = 0 : i64, tpu.core_type = #tpu.core_type<tc>, window_params = [{transform_indices = @transform_0, window_bounds = array<i64: 1, 8, 32>}, {pipeline_mode = #tpu.pipeline_mode<synchronous>, transform_indices = @transform_1, window_bounds = array<i64: 1, 32>}, {pipeline_mode = #tpu.pipeline_mode<synchronous>, transform_indices = @transform_2, window_bounds = array<i64: 1, 32>}, {pipeline_mode = #tpu.pipeline_mode<synchronous>, transform_indices = @transform_3, window_bounds = array<i64: 4, 32, 8>}, {pipeline_mode = #tpu.pipeline_mode<synchronous>, transform_indices = @transform_4, window_bounds = array<i64: 4, 32, 8>}, {pipeline_mode = #tpu.pipeline_mode<synchronous>, transform_indices = @transform_5, window_bounds = array<i64: 4, 32, 8>}, {pipeline_mode = #tpu.pipeline_mode<synchronous>, transform_indices = @transform_6, window_bounds = array<i64: 4, 8, 32>}, {pipeline_mode = #tpu.pipeline_mode<synchronous>, transform_indices = @transform_7, window_bounds = array<i64: 1, 32>}, {pipeline_mode = #tpu.pipeline_mode<synchronous>, transform_indices = @transform_8, window_bounds = array<i64: 1, 32>}, {pipeline_mode = #tpu.pipeline_mode<synchronous>, transform_indices = @transform_9, window_bounds = array<i64: 1, 32>}, {pipeline_mode = #tpu.pipeline_mode<synchronous>, transform_indices = @transform_10, window_bounds = array<i64: 32, 128>}, {pipeline_mode = #tpu.pipeline_mode<synchronous>, transform_indices = @transform_11, window_bounds = array<i64: 1, 128>}, {pipeline_mode = #tpu.pipeline_mode<synchronous>, transform_indices = @transform_12, window_bounds = array<i64: 128, 32>}, {pipeline_mode = #tpu.pipeline_mode<synchronous>, transform_indices = @transform_13, window_bounds = array<i64: 1, 32>}, {transform_indices = @transform_14, window_bounds = array<i64: 1, 8, 32>}]} {
    %c0 = arith.constant 0 : index
    %c0_0 = arith.constant 0 : index
    %c0_1 = arith.constant 0 : index
    %0 = vector.load %arg1[%c0, %c0_0, %c0_1] : memref<1x8x32xf32, #tpu.memory_space<vmem>>, vector<1x8x32xf32>
    %1 = vector.shape_cast %0 : vector<1x8x32xf32> to vector<8x32xf32>
    %c0_2 = arith.constant 0 : index
    %c0_3 = arith.constant 0 : index
    %2 = vector.load %arg2[%c0_2, %c0_3] : memref<1x32xf32, #tpu.memory_space<vmem>>, vector<1x32xf32>
    %c0_4 = arith.constant 0 : index
    %c0_5 = arith.constant 0 : index
    %3 = vector.load %arg3[%c0_4, %c0_5] : memref<1x32xf32, #tpu.memory_space<vmem>>, vector<1x32xf32>
    %cst = arith.constant dense<0.000000e+00> : vector<8xf32>
    %4 = vector.multi_reduction <add>, %1, %cst [1] : vector<8x32xf32> to vector<8xf32>
    %5 = vector.shape_cast %4 : vector<8xf32> to vector<8x1xf32>
    %cst_6 = arith.constant 3.200000e+01 : f32
    %6 = vector.broadcast %cst_6 : f32 to vector<8x1xf32>
    %7 = arith.divf %5, %6 : vector<8x1xf32>
    %8 = vector.broadcast %7 : vector<8x1xf32> to vector<8x32xf32>
    %9 = arith.subf %1, %8 : vector<8x32xf32>
    %10 = arith.mulf %9, %9 : vector<8x32xf32>
    %cst_7 = arith.constant dense<0.000000e+00> : vector<8xf32>
    %11 = vector.multi_reduction <add>, %10, %cst_7 [1] : vector<8x32xf32> to vector<8xf32>
    %12 = vector.shape_cast %11 : vector<8xf32> to vector<8x1xf32>
    %cst_8 = arith.constant 3.200000e+01 : f32
    %13 = vector.broadcast %cst_8 : f32 to vector<8x1xf32>
    %14 = arith.divf %12, %13 : vector<8x1xf32>
    %cst_9 = arith.constant 9.99999974E-6 : f32
    %15 = vector.broadcast %cst_9 : f32 to vector<8x1xf32>
    %16 = arith.addf %14, %15 : vector<8x1xf32>
    %17 = math.rsqrt %16 : vector<8x1xf32>
    %18 = vector.broadcast %17 : vector<8x1xf32> to vector<8x32xf32>
    %19 = arith.mulf %9, %18 : vector<8x32xf32>
    %20 = vector.broadcast %2 : vector<1x32xf32> to vector<8x32xf32>
    %21 = arith.mulf %19, %20 : vector<8x32xf32>
    %22 = vector.broadcast %3 : vector<1x32xf32> to vector<8x32xf32>
    %23 = arith.addf %21, %22 : vector<8x32xf32>
    %24 = arith.truncf %23 : vector<8x32xf32> to vector<8x32xbf16>
    %25 = vector.shape_cast %24 : vector<8x32xbf16> to vector<1x8x32xbf16>
    %26 = vector.shape_cast %25 : vector<1x8x32xbf16> to vector<1x8x32xbf16>
    %27 = vector.broadcast %26 : vector<1x8x32xbf16> to vector<4x8x32xbf16>
    %c0_10 = arith.constant 0 : index
    %c0_11 = arith.constant 0 : index
    %c0_12 = arith.constant 0 : index
    %28 = vector.load %arg4[%c0_10, %c0_11, %c0_12] : memref<4x32x8xbf16, #tpu.memory_space<vmem>>, vector<4x32x8xbf16>
    "tpu.trace_start"() <{level = 10 : i32, message = "hnd,hde->hne"}> : () -> ()
    %cst_13 = arith.constant dense<0.000000e+00> : vector<4x8x8xf32>
    %29 = tpu.matmul %27, %28, %cst_13 {dimension_numbers = #tpu.dot_dimension_numbers<[2], [1], [1], [2], [0, 0, 0, 1, 1, 2], [0], [0]>} : vector<4x8x32xbf16>, vector<4x32x8xbf16>, vector<4x8x8xf32> -> vector<4x8x8xf32>
    "tpu.trace_stop"() : () -> ()
    %c0_14 = arith.constant 0 : index
    %c0_15 = arith.constant 0 : index
    %c0_16 = arith.constant 0 : index
    %30 = vector.load %arg5[%c0_14, %c0_15, %c0_16] : memref<4x32x8xbf16, #tpu.memory_space<vmem>>, vector<4x32x8xbf16>
    "tpu.trace_start"() <{level = 10 : i32, message = "hnd,hde->hne"}> : () -> ()
    %cst_17 = arith.constant dense<0.000000e+00> : vector<4x8x8xf32>
    %31 = tpu.matmul %27, %30, %cst_17 {dimension_numbers = #tpu.dot_dimension_numbers<[2], [1], [1], [2], [0, 0, 0, 1, 1, 2], [0], [0]>} : vector<4x8x32xbf16>, vector<4x32x8xbf16>, vector<4x8x8xf32> -> vector<4x8x8xf32>
    "tpu.trace_stop"() : () -> ()
    %c0_18 = arith.constant 0 : index
    %c0_19 = arith.constant 0 : index
    %c0_20 = arith.constant 0 : index
    %32 = vector.load %arg6[%c0_18, %c0_19, %c0_20] : memref<4x32x8xbf16, #tpu.memory_space<vmem>>, vector<4x32x8xbf16>
    "tpu.trace_start"() <{level = 10 : i32, message = "hnd,hde->hne"}> : () -> ()
    %cst_21 = arith.constant dense<0.000000e+00> : vector<4x8x8xf32>
    %33 = tpu.matmul %27, %32, %cst_21 {dimension_numbers = #tpu.dot_dimension_numbers<[2], [1], [1], [2], [0, 0, 0, 1, 1, 2], [0], [0]>} : vector<4x8x32xbf16>, vector<4x32x8xbf16>, vector<4x8x8xf32> -> vector<4x8x8xf32>
    "tpu.trace_stop"() : () -> ()
    %34 = arith.truncf %29 : vector<4x8x8xf32> to vector<4x8x8xbf16>
    %35 = arith.truncf %31 : vector<4x8x8xf32> to vector<4x8x8xbf16>
    "tpu.trace_start"() <{level = 10 : i32, message = "hqe,hke->hqk"}> : () -> ()
    %cst_22 = arith.constant dense<0.000000e+00> : vector<4x8x8xf32>
    %36 = tpu.matmul %34, %35, %cst_22 {dimension_numbers = #tpu.dot_dimension_numbers<[2], [2], [1], [1], [0, 0, 0, 1, 1, 1], [0], [0]>} : vector<4x8x8xbf16>, vector<4x8x8xbf16>, vector<4x8x8xf32> -> vector<4x8x8xf32>
    "tpu.trace_stop"() : () -> ()
    %cst_23 = arith.constant dense<0xFF800000> : vector<4x8xf32>
    %37 = vector.multi_reduction <maximumf>, %36, %cst_23 [2] : vector<4x8x8xf32> to vector<4x8xf32>
    %38 = vector.shape_cast %37 : vector<4x8xf32> to vector<4x8x1xf32>
    %39 = vector.broadcast %38 : vector<4x8x1xf32> to vector<4x8x8xf32>
    %40 = arith.subf %36, %39 : vector<4x8x8xf32>
    %41 = math.exp %40 : vector<4x8x8xf32>
    %cst_24 = arith.constant dense<0.000000e+00> : vector<4x8xf32>
    %42 = vector.multi_reduction <add>, %41, %cst_24 [2] : vector<4x8x8xf32> to vector<4x8xf32>
    %43 = vector.shape_cast %42 : vector<4x8xf32> to vector<4x8x1xf32>
    %44 = tpu.reciprocal %43 {approx = true} : vector<4x8x1xf32> -> vector<4x8x1xf32>
    %45 = vector.broadcast %44 : vector<4x8x1xf32> to vector<4x8x8xf32>
    %46 = arith.mulf %41, %45 : vector<4x8x8xf32>
    %47 = arith.truncf %46 : vector<4x8x8xf32> to vector<4x8x8xbf16>
    %48 = arith.truncf %33 : vector<4x8x8xf32> to vector<4x8x8xbf16>
    "tpu.trace_start"() <{level = 10 : i32, message = "hqk,hke->hqe"}> : () -> ()
    %cst_25 = arith.constant dense<0.000000e+00> : vector<4x8x8xf32>
    %49 = tpu.matmul %47, %48, %cst_25 {dimension_numbers = #tpu.dot_dimension_numbers<[2], [1], [1], [2], [0, 0, 0, 1, 1, 2], [0], [0]>} : vector<4x8x8xbf16>, vector<4x8x8xbf16>, vector<4x8x8xf32> -> vector<4x8x8xf32>
    "tpu.trace_stop"() : () -> ()
    %50 = arith.truncf %49 : vector<4x8x8xf32> to vector<4x8x8xbf16>
    %c0_26 = arith.constant 0 : index
    %c0_27 = arith.constant 0 : index
    %c0_28 = arith.constant 0 : index
    %51 = vector.load %arg7[%c0_26, %c0_27, %c0_28] : memref<4x8x32xbf16, #tpu.memory_space<vmem>>, vector<4x8x32xbf16>
    "tpu.trace_start"() <{level = 10 : i32, message = "hne,hed->hnd"}> : () -> ()
    %cst_29 = arith.constant dense<0.000000e+00> : vector<4x8x32xf32>
    %52 = tpu.matmul %50, %51, %cst_29 {dimension_numbers = #tpu.dot_dimension_numbers<[2], [1], [1], [2], [0, 0, 0, 1, 1, 2], [0], [0]>} : vector<4x8x8xbf16>, vector<4x8x32xbf16>, vector<4x8x32xf32> -> vector<4x8x32xf32>
    "tpu.trace_stop"() : () -> ()
    %cst_30 = arith.constant dense<0.000000e+00> : vector<8x32xf32>
    %53 = vector.multi_reduction <add>, %52, %cst_30 [0] : vector<4x8x32xf32> to vector<8x32xf32>
    %c0_31 = arith.constant 0 : index
    %c0_32 = arith.constant 0 : index
    %54 = vector.load %arg8[%c0_31, %c0_32] : memref<1x32xf32, #tpu.memory_space<vmem>>, vector<1x32xf32>
    %55 = vector.broadcast %54 : vector<1x32xf32> to vector<8x32xf32>
    %56 = arith.addf %53, %55 : vector<8x32xf32>
    %57 = arith.addf %1, %56 : vector<8x32xf32>
    %c0_33 = arith.constant 0 : index
    %c0_34 = arith.constant 0 : index
    %58 = vector.load %arg9[%c0_33, %c0_34] : memref<1x32xf32, #tpu.memory_space<vmem>>, vector<1x32xf32>
    %c0_35 = arith.constant 0 : index
    %c0_36 = arith.constant 0 : index
    %59 = vector.load %arg10[%c0_35, %c0_36] : memref<1x32xf32, #tpu.memory_space<vmem>>, vector<1x32xf32>
    %cst_37 = arith.constant dense<0.000000e+00> : vector<8xf32>
    %60 = vector.multi_reduction <add>, %57, %cst_37 [1] : vector<8x32xf32> to vector<8xf32>
    %61 = vector.shape_cast %60 : vector<8xf32> to vector<8x1xf32>
    %cst_38 = arith.constant 3.200000e+01 : f32
    %62 = vector.broadcast %cst_38 : f32 to vector<8x1xf32>
    %63 = arith.divf %61, %62 : vector<8x1xf32>
    %64 = vector.broadcast %63 : vector<8x1xf32> to vector<8x32xf32>
    %65 = arith.subf %57, %64 : vector<8x32xf32>
    %66 = arith.mulf %65, %65 : vector<8x32xf32>
    %cst_39 = arith.constant dense<0.000000e+00> : vector<8xf32>
    %67 = vector.multi_reduction <add>, %66, %cst_39 [1] : vector<8x32xf32> to vector<8xf32>
    %68 = vector.shape_cast %67 : vector<8xf32> to vector<8x1xf32>
    %cst_40 = arith.constant 3.200000e+01 : f32
    %69 = vector.broadcast %cst_40 : f32 to vector<8x1xf32>
    %70 = arith.divf %68, %69 : vector<8x1xf32>
    %cst_41 = arith.constant 9.99999974E-6 : f32
    %71 = vector.broadcast %cst_41 : f32 to vector<8x1xf32>
    %72 = arith.addf %70, %71 : vector<8x1xf32>
    %73 = math.rsqrt %72 : vector<8x1xf32>
    %74 = vector.broadcast %73 : vector<8x1xf32> to vector<8x32xf32>
    %75 = arith.mulf %65, %74 : vector<8x32xf32>
    %76 = vector.broadcast %58 : vector<1x32xf32> to vector<8x32xf32>
    %77 = arith.mulf %75, %76 : vector<8x32xf32>
    %78 = vector.broadcast %59 : vector<1x32xf32> to vector<8x32xf32>
    %79 = arith.addf %77, %78 : vector<8x32xf32>
    %80 = arith.truncf %79 : vector<8x32xf32> to vector<8x32xbf16>
    %c0_42 = arith.constant 0 : index
    %c0_43 = arith.constant 0 : index
    %81 = vector.load %arg11[%c0_42, %c0_43] : memref<32x128xbf16, #tpu.memory_space<vmem>>, vector<32x128xbf16>
    %cst_44 = arith.constant dense<0.000000e+00> : vector<8x128xf32>
    %82 = tpu.matmul %80, %81, %cst_44 {dimension_numbers = #tpu.dot_dimension_numbers<[1], [0], [0], [1], [0, 0, 1, 1], [], []>} : vector<8x32xbf16>, vector<32x128xbf16>, vector<8x128xf32> -> vector<8x128xf32>
    %c0_45 = arith.constant 0 : index
    %c0_46 = arith.constant 0 : index
    %83 = vector.load %arg12[%c0_45, %c0_46] : memref<1x128xf32, #tpu.memory_space<vmem>>, vector<1x128xf32>
    %84 = vector.broadcast %83 : vector<1x128xf32> to vector<8x128xf32>
    %85 = arith.addf %82, %84 : vector<8x128xf32>
    %cst_47 = arith.constant 5.000000e-01 : f32
    %86 = vector.broadcast %cst_47 : f32 to vector<8x128xf32>
    %87 = arith.mulf %86, %85 : vector<8x128xf32>
    %cst_48 = arith.constant 0.707106769 : f32
    %88 = vector.broadcast %cst_48 : f32 to vector<8x128xf32>
    %89 = arith.mulf %85, %88 : vector<8x128xf32>
    %90 = math.erf %89 : vector<8x128xf32>
    %cst_49 = arith.constant 1.000000e+00 : f32
    %91 = vector.broadcast %cst_49 : f32 to vector<8x128xf32>
    %92 = arith.addf %91, %90 : vector<8x128xf32>
    %93 = arith.mulf %87, %92 : vector<8x128xf32>
    %94 = arith.truncf %93 : vector<8x128xf32> to vector<8x128xbf16>
    %c0_50 = arith.constant 0 : index
    %c0_51 = arith.constant 0 : index
    %95 = vector.load %arg13[%c0_50, %c0_51] : memref<128x32xbf16, #tpu.memory_space<vmem>>, vector<128x32xbf16>
    %cst_52 = arith.constant dense<0.000000e+00> : vector<8x32xf32>
    %96 = tpu.matmul %94, %95, %cst_52 {dimension_numbers = #tpu.dot_dimension_numbers<[1], [0], [0], [1], [0, 0, 1, 1], [], []>} : vector<8x128xbf16>, vector<128x32xbf16>, vector<8x32xf32> -> vector<8x32xf32>
    %c0_53 = arith.constant 0 : index
    %c0_54 = arith.constant 0 : index
    %97 = vector.load %arg14[%c0_53, %c0_54] : memref<1x32xf32, #tpu.memory_space<vmem>>, vector<1x32xf32>
    %98 = vector.broadcast %97 : vector<1x32xf32> to vector<8x32xf32>
    %99 = arith.addf %96, %98 : vector<8x32xf32>
    %100 = arith.addf %57, %99 : vector<8x32xf32>
    %c0_55 = arith.constant 0 : index
    %c0_56 = arith.constant 0 : index
    %c0_57 = arith.constant 0 : index
    %101 = vector.load %arg15[%c0_55, %c0_56, %c0_57] : memref<1x8x32xf32, #tpu.memory_space<vmem>>, vector<1x8x32xf32>
    %102 = vector.shape_cast %101 : vector<1x8x32xf32> to vector<8x32xf32>
    %103 = vector.shape_cast %100 : vector<8x32xf32> to vector<1x8x32xf32>
    tpu.vector_store %arg15[%c0_55, %c0_56, %c0_57], %103 {strides = array<i32>} : memref<1x8x32xf32, #tpu.memory_space<vmem>>, vector<1x8x32xf32>,
    return
  }
  func.func @transform_0(%arg0: i32) -> (i32, i32, i32) {
    %c0_i32 = arith.constant 0 : i32
    %c0_i32_0 = arith.constant 0 : i32
    %c0_i32_1 = arith.constant 0 : i32
    return %arg0, %c0_i32, %c0_i32_0 : i32, i32, i32
  }
  func.func @transform_1(%arg0: i32) -> (i32, i32) {
    %c0_i32 = arith.constant 0 : i32
    %c0_i32_0 = arith.constant 0 : i32
    %c0_i32_1 = arith.constant 0 : i32
    return %c0_i32, %c0_i32_0 : i32, i32
  }
  func.func @transform_2(%arg0: i32) -> (i32, i32) {
    %c0_i32 = arith.constant 0 : i32
    %c0_i32_0 = arith.constant 0 : i32
    %c0_i32_1 = arith.constant 0 : i32
    return %c0_i32, %c0_i32_0 : i32, i32
  }
  func.func @transform_3(%arg0: i32) -> (i32, i32, i32) {
    %c0_i32 = arith.constant 0 : i32
    %c0_i32_0 = arith.constant 0 : i32
    %c0_i32_1 = arith.constant 0 : i32
    %c0_i32_2 = arith.constant 0 : i32
    return %c0_i32, %c0_i32_0, %c0_i32_1 : i32, i32, i32
  }
  func.func @transform_4(%arg0: i32) -> (i32, i32, i32) {
    %c0_i32 = arith.constant 0 : i32
    %c0_i32_0 = arith.constant 0 : i32
    %c0_i32_1 = arith.constant 0 : i32
    %c0_i32_2 = arith.constant 0 : i32
    return %c0_i32, %c0_i32_0, %c0_i32_1 : i32, i32, i32
  }
  func.func @transform_5(%arg0: i32) -> (i32, i32, i32) {
    %c0_i32 = arith.constant 0 : i32
    %c0_i32_0 = arith.constant 0 : i32
    %c0_i32_1 = arith.constant 0 : i32
    %c0_i32_2 = arith.constant 0 : i32
    return %c0_i32, %c0_i32_0, %c0_i32_1 : i32, i32, i32
  }
  func.func @transform_6(%arg0: i32) -> (i32, i32, i32) {
    %c0_i32 = arith.constant 0 : i32
    %c0_i32_0 = arith.constant 0 : i32
    %c0_i32_1 = arith.constant 0 : i32
    %c0_i32_2 = arith.constant 0 : i32
    return %c0_i32, %c0_i32_0, %c0_i32_1 : i32, i32, i32
  }
  func.func @transform_7(%arg0: i32) -> (i32, i32) {
    %c0_i32 = arith.constant 0 : i32
    %c0_i32_0 = arith.constant 0 : i32
    %c0_i32_1 = arith.constant 0 : i32
    return %c0_i32, %c0_i32_0 : i32, i32
  }
  func.func @transform_8(%arg0: i32) -> (i32, i32) {
    %c0_i32 = arith.constant 0 : i32
    %c0_i32_0 = arith.constant 0 : i32
    %c0_i32_1 = arith.constant 0 : i32
    return %c0_i32, %c0_i32_0 : i32, i32
  }
  func.func @transform_9(%arg0: i32) -> (i32, i32) {
    %c0_i32 = arith.constant 0 : i32
    %c0_i32_0 = arith.constant 0 : i32
    %c0_i32_1 = arith.constant 0 : i32
    return %c0_i32, %c0_i32_0 : i32, i32
  }
  func.func @transform_10(%arg0: i32) -> (i32, i32) {
    %c0_i32 = arith.constant 0 : i32
    %c0_i32_0 = arith.constant 0 : i32
    %c0_i32_1 = arith.constant 0 : i32
    return %c0_i32, %c0_i32_0 : i32, i32
  }
  func.func @transform_11(%arg0: i32) -> (i32, i32) {
    %c0_i32 = arith.constant 0 : i32
    %c0_i32_0 = arith.constant 0 : i32
    %c0_i32_1 = arith.constant 0 : i32
    return %c0_i32, %c0_i32_0 : i32, i32
  }
  func.func @transform_12(%arg0: i32) -> (i32, i32) {
    %c0_i32 = arith.constant 0 : i32
    %c0_i32_0 = arith.constant 0 : i32
    %c0_i32_1 = arith.constant 0 : i32
    return %c0_i32, %c0_i32_0 : i32, i32
  }
  func.func @transform_13(%arg0: i32) -> (i32, i32) {
    %c0_i32 = arith.constant 0 : i32
    %c0_i32_0 = arith.constant 0 : i32
    %c0_i32_1 = arith.constant 0 : i32
    return %c0_i32, %c0_i32_0 : i32, i32
  }
  func.func @transform_14(%arg0: i32) -> (i32, i32, i32) {
    %c0_i32 = arith.constant 0 : i32
    %c0_i32_0 = arith.constant 0 : i32
    %c0_i32_1 = arith.constant 0 : i32
    return %arg0, %c0_i32, %c0_i32_0 : i32, i32, i32
  }
}

</mosaic_0001>

<bundles_post_ra>
// kernel: tpu_custom_call.1
= control target key start
LH: loop header
LB: loop body
LE: loop exit
PB: predicated region body
PF: predicated region fallthrough
CT: control target
= control target key end

     0   :  { %s2147_s0 = inlined_call_operand.vmem [shape: f32[2,8,32], index: 0, kind: input, shape index: {}]   ;;  %s2148_s1 = inlined_call_operand.vmem [shape: f32[1,32], index: 1, kind: input, shape index: {}]   ;;  %s2149_s2 = inlined_call_operand.vmem [shape: f32[1,32], index: 2, kind: input, shape index: {}]   ;;  %s2150_s3 = inlined_call_operand.vmem [shape: bf16[4,32,8], index: 3, kind: input, shape index: {}]   ;;  %s2151_s4 = inlined_call_operand.vmem [shape: bf16[4,32,8], index: 4, kind: input, shape index: {}]   ;;  %s2152_s5 = inlined_call_operand.vmem [shape: bf16[4,32,8], index: 5, kind: input, shape index: {}]   ;;  %s2153_s6 = inlined_call_operand.vmem [shape: bf16[4,8,32], index: 6, kind: input, shape index: {}]   ;;  %s2154_s7 = inlined_call_operand.vmem [shape: f32[1,32], index: 7, kind: input, shape index: {}]   ;;  %s2155_s8 = inlined_call_operand.vmem [shape: f32[1,32], index: 8, kind: input, shape index: {}]   ;;  %s2156_s9 = inlined_call_operand.vmem [shape: f32[1,32], index: 9, kind: input, shape index: {}]   ;;  %s2157_s10 = inlined_call_operand.vmem [shape: bf16[32,128], index: 10, kind: input, shape index: {}]   ;;  %s2158_s11 = inlined_call_operand.vmem [shape: f32[1,128], index: 11, kind: input, shape index: {}]   ;;  %s2159_s12 = inlined_call_operand.vmem [shape: bf16[128,32], index: 12, kind: input, shape index: {}]   ;;  %s2160_s13 = inlined_call_operand.vmem [shape: f32[1,32], index: 13, kind: input, shape index: {}]   ;;  %s2161_s14 = inlined_call_operand.hbm [shape: f32[2,8,32], index: 14, kind: output, shape index: {}]  }
   0x1   :  { %2163 = sst [smem:[#allocation7_spill]] %s2147_s0 }
   0x2   :  { %2164 = sst [smem:[#allocation8_spill]] %s2148_s1 }
   0x3   :  { %2165 = sst [smem:[#allocation9_spill]] %s2149_s2 }
   0x4   :  { %19 = vsyncpa [#allocation3], 0 }
   0x5   :  { %21 = vsyncpa [#allocation3 + $0x1], 0  ;;  %s1857_s29 = smov 0   ;;  %s1859_s30 = smov 0  }
   0x6   :  { %s1861_s15 = smov 0   ;;  %s1863_s16 = smov 0  }
   0x7 LB: > { %2166 = sst [smem:[#allocation5_spill]] %s1775_s15  ;;  %s1878_s17 = sadd.s32 4294967295, %s1779_s16   ;;  %s1779_s16 = sphi %s1863_s16, %s2177_s16   ;;  %s1775_s15 = sphi %s1861_s15, %s2174_s15   ;;  %s1771_s30 = sphi %s1859_s30, %s2176_s30   ;;  %s1767_s29 = sphi %s1857_s29, %s2175_s29  }
   0x8   : > { %s1440_s18 = sadd.s32 4294967294, %s1779_s16   ;;  %s1882_s19 = sadd.s32 1, %s1779_s16  }
   0x9   : > { %s333_s20 = sadd.s32 1, %s1775_s15  ;;  %s330_s21 = ssub.s32 %s1779_s16, %s1882_s19 }
   0xa   : > { %p343_p0 = scmp.ne.s32.totalorder %s1775_s15, %s1771_s30  ;;  %p331_p1 = scmp.eq.s32.totalorder %s330_s21, 0 }
   0xb   : > { %p344_p2 = scmp.eq.s32.totalorder %s1878_s17, 1  ;;  %p349_p3 = scmp.ne.s32.totalorder %s1771_s30, %s1767_s29 }
   0xc   : > { %p350_p4 = scmp.eq.s32.totalorder %s1440_s18, 1  ;;  %p1443_p7 = scmp.ge.s32.totalorder %s1779_s16, 1 }
   0xd   : > { %s1893_s22 = scalar_select %p331_p1, %s1775_s15, %s333_s20  }
   0xe   : > { %p1895_p5 = por %p344_p2, %p343_p0  ;;  %p1899_p6 = por %p350_p4, %p349_p3 }
   0xf   : > { %2167 = sst [smem:[#allocation6_spill]] %s1893_s22  ;;  %p414_p8 = scmp.lt.s32.totalorder %s1779_s16, 3 }
  0x11   : > { %p415_p9 = pnand %p1443_p7, %p414_p8 }
  0x12   : > { %p459_p10 = scmp.lt.s32.totalorder (!%p415_p9), %s1878_s17, 1  ;;  %s2170_s0 = sld [smem:[#allocation7_spill]] (!%p415_p9) }
  0x13   : > { %418 = sbr.rel (%p415_p9) target bundleno = 1727 (0x6bf), region = 76  ;;  %s2171_s1 = sld [smem:[#allocation8_spill]] (!%p415_p9) }
  0x14   : > { %s2172_s2 = sld [smem:[#allocation9_spill]] (!%p415_p9)  ;;  %s456_s22 = sand.u32 (!%p415_p9), 1, %s1771_s30  }
  0x15   : > { %s1609_s20 = sshll.u32 (!%p415_p9), %s1878_s17, 3 }
  0x16   : > { %s1376_s28 = scalar_lea.hbm (!%p415_p9), %s2161_s14, %s1609_s20 }
  0x18   : > { %s460_s25 = scalar_select %p459_p10, %s1878_s17, 1  ;;  %vm467_vm0 = vcmask 261120   ;;  %v1781_v2 = vmov 32.0   ;;  %v1613_v14 = vld [vmem:[%s2150_s3 + $0x8] sm:$0xff]  ;;  %v1615_v15 = vld [vmem:[%s2150_s3 + $0x18] sm:$0xff]  ;;  %v1612_v18 = vld [vmem:[%s2150_s3] sm:$0xff] }
  0x19   : > { %1693 = vrcp.f32 %v1781_v2  ;;  %v1619_v16 = vld [vmem:[%s2150_s3 + $0x38] sm:$0xff]  ;;  %543 = vmatpush.bf16.msra.mxu0 %v1613_v14  ;;  %568 = vmatpush.bf16.msra.mxu2 %v1615_v15  ;;  %v1614_v19 = vld [vmem:[%s2150_s3 + $0x10] sm:$0xff]  ;;  %v1617_v23 = vld [vmem:[%s2150_s3 + $0x28] sm:$0xff]  ;;  %vm865_vm5 = vcmask 64512   ;;  %vm997_vm6 = vcmask 1043456   ;;  %s1366_s17 = scalar_lea.sflag [#allocation3], %s456_s22 }
  0x1a   : > { %s1445_s26 = sshll.u32 %s460_s25, 3  ;;  %v1623_v17 = vld [vmem:[%s2151_s4 + $0x18] sm:$0xff]  ;;  %618 = vmatpush.bf16.msra.mxu3 %v1619_v16  ;;  %v1618_v20 = vld [vmem:[%s2150_s3 + $0x30] sm:$0xff]  ;;  %v1621_v24 = vld [vmem:[%s2151_s4 + $0x8] sm:$0xff] }
  0x1b   : > { %s462_s18 = scalar_lea.vmem %s2170_s0, %s1445_s26  ;;  %684 = vmatpush.bf16.msra.mxu1 %v1623_v17  ;;  %v1622_v21 = vld [vmem:[%s2151_s4 + $0x10] sm:$0xff]  ;;  %v1627_v25 = vld [vmem:[%s2151_s4 + $0x38] sm:$0xff]  ;;  %v1616_v28 = vld [vmem:[%s2150_s3 + $0x20] sm:$0xff] }
  0x1c   : > { %v1910_v0 = vld [vmem:[%s462_s18] sm:$0xff]  ;;  %v1631_v27 = vld [vmem:[%s2152_s5 + $0x18] sm:$0xff]  ;;  %v1626_v31 = vld [vmem:[%s2151_s4 + $0x30] sm:$0xff]  ;;  %s1444_s18 = sshll.u32 %s456_s22, 3 }
  0x1d   : > { %v468_v1 = vsel %vm467_vm0, %v1910_v0, 0.0  ;;  %544 = vmatpush.bf16.msra.mxu0 %v1612_v18  ;;  %569 = vmatpush.bf16.msra.mxu2 %v1614_v19  ;;  %v1620_v29 = vld [vmem:[%s2151_s4] sm:$0xff]  ;;  %v1630_v32 = vld [vmem:[%s2152_s5 + $0x10] sm:$0xff]  ;;  %v1625_v46 = vld [vmem:[%s2151_s4 + $0x28] sm:$0xff]  ;;  %s458_s0 = scalar_lea.vmem [#allocation2], %s1444_s18  ;;  %s1737_s18 = scalar_lea.hbm %s2161_s14, 16 }
  0x1e   : > { %469 = vadd.xlane.f32.xlu0 %v468_v1  ;;  %619 = vmatpush.bf16.msra.mxu3 %v1618_v20  ;;  %v1686_v39 = vld [vmem:[%s2171_s1] ss:$0 sm:$0xff]  ;;  %v1629_v47 = vld [vmem:[%s2152_s5 + $0x8] sm:$0xff]  ;;  %v1635_v48 = vld [vmem:[%s2152_s5 + $0x38] sm:$0xff]  ;;  %s1378_s15 = sshll.u32 %s458_s0, 4  ;;  %s1380_s1 = sshll.u32 %s1376_s28, 4  ;;  %s1379_s15 = int_to_ptr.vmem [resolvable:$true] %s1378_s15  ;;  %s1381_s1 = int_to_ptr.hbm [resolvable:$true] %s1380_s1 }
  0x1f   : > { %v1694_v3 = vpop.eup %1693  ;;  %685 = vmatpush.bf16.msra.mxu1 %v1622_v21  ;;  %v1687_v41 = vld [vmem:[%s2172_s2] ss:$0 sm:$0xff]  ;;  %v1634_v51 = vld [vmem:[%s2152_s5 + $0x30] sm:$0xff]  ;;  %v1633_v52 = vld [vmem:[%s2152_s5 + $0x28] sm:$0xff]  ;;  %s1731_s2 = sshra.s32 %s1381_s1, 4  ;;  %s1732_s2 = int_to_ptr.hbm [resolvable:$true] %s1731_s2 }
  0x20   : > { %v472_v4 = vmul.f32 32.0, %v1694_v3  ;;  %vm476_vm1 = vweird.f32 %v1694_v3  ;;  %v1624_v49 = vld [vmem:[%s2151_s4 + $0x20] sm:$0xff]  ;;  %s1733_s21 = scalar_lea.hbm %s1732_s2, 8  ;;  %p1738_p0 = scmp.lt.s32.totalorder %s1732_s2, %s2161_s14 }
  0x21   : > { %593 = vmatpush.bf16.msrb.mxu2 %v1617_v23  ;;  %659 = vmatpush.bf16.msrb.mxu0 %v1621_v24  ;;  %v1628_v50 = vld [vmem:[%s2152_s5] sm:$0xff]  ;;  %p1734_p11 = scmp.ne.s32.totalorder %s1732_s2, %s1733_s21  ;;  %p1739_p1 = scmp.lt.s32.totalorder %s1737_s18, %s1733_s21 }
  0x22   : > { %v473_v5 = vsub.f32 1.0, %v472_v4  ;;  %734 = vmatpush.bf16.msrb.mxu3 %v1627_v25  ;;  %v1632_v53 = vld [vmem:[%s2152_s5 + $0x20] sm:$0xff] }
  0x23   : > { %800 = vmatpush.bf16.msrb.mxu1 %v1631_v27  ;;  %p1735_p12 = pnand %p1734_p11, %p1895_p5  ;;  %p1740_p2 = por %p1739_p1, %p1738_p0 }
  0x24   : > { %v474_v6 = vmul.f32 %v1694_v3, %v473_v5 }
  0x25   : > { %594 = vmatpush.bf16.msrb.mxu2 %v1616_v28  ;;  %660 = vmatpush.bf16.msrb.mxu0 %v1620_v29  ;;  %p1736_p13 = pneg %p1735_p12 }
  0x26   : > { %v475_v7 = vadd.f32 %v1694_v3, %v474_v6  ;;  %735 = vmatpush.bf16.msrb.mxu3 %v1626_v31 }
  0x27   : > { %801 = vmatpush.bf16.msrb.mxu1 %v1630_v32  ;;  %p1741_p3 = pnand %p1740_p2, %p1736_p13 }
  0x28   : > { %v1914_v8 = vsel %vm476_vm1, %v1694_v3, %v475_v7 }
  0x91   : > { %v470_v9 = vpop.xlane.xlu0 %469 }
  0x92   : > { %v478_v10 = vmul.f32 %v1914_v8, %v470_v9 }
  0x94   : > { %v479_v11 = vsub.f32 %v1910_v0, %v478_v10 }
  0x96   : > { %v480_v12 = vmul.f32 %v479_v11, %v479_v11 }
  0x98   : > { %v481_v13 = vsel %vm467_vm0, %v480_v12, 0.0 }
  0x99   : > { %482 = vadd.xlane.f32.xlu0 %v481_v13 }
 0x10c   : > { %v483_v22 = vpop.xlane.xlu0 %482 }
 0x10d   : > { %v484_v26 = vmul.f32 %v483_v22, %v1914_v8 }
 0x10f   : > { %v485_v30 = vadd.f32 1e-05, %v484_v26 }
 0x111   : > { %1695 = vrsqrt.f32 %v485_v30  ;;  %vm492_vm3 = vweird.f32 %v485_v30 }
 0x117   : > { %v1696_v33 = vpop.eup %1695 }
 0x118   : > { %v487_v34 = vmul.f32 %v1696_v33, %v485_v30  ;;  %vm493_vm2 = vweird.f32 %v1696_v33 }
 0x119   : > { %vm494_vm4 = vmor %vm492_vm3, %vm493_vm2 }
 0x11a   : > { %v488_v35 = vmul.f32 %v1696_v33, %v487_v34 }
 0x11c   : > { %v489_v36 = vmul.f32 0.5, %v488_v35 }
 0x11e   : > { %v490_v37 = vsub.f32 1.5, %v489_v36 }
 0x120   : > { %v491_v38 = vmul.f32 %v1696_v33, %v490_v37 }
 0x122   : > { %v495_v40 = vsel %vm494_vm4, %v1696_v33, %v491_v38 }
 0x123   : > { %v496_v42 = vmul.f32 %v495_v40, %v479_v11 }
 0x125   : > { %v500_v43 = vmul.f32 %v1686_v39, %v496_v42 }
 0x127   : > { %v504_v44 = vadd.f32 %v1687_v41, %v500_v43 }
 0x129   : > { %v505_v45 = vpack.c.bf16 %v504_v44, %v504_v44 }
 0x12b   : > { %1454 = vmatmul.msk.bf16.vlgmr.msra.gmra.mxu0 %vm467_vm0, %v505_v45  ;;  %1463 = vmatmul.msk.bf16.vlgmr.msra.gmra.mxu2 %vm467_vm0, %v505_v45 }
 0x12c   : > { %1481 = vmatmul.msk.bf16.vlgmr.msra.gmra.mxu3 %vm467_vm0, %v505_v45  ;;  %1499 = vmatmul.msk.bf16.vlgmr.msra.gmra.mxu1 %vm467_vm0, %v505_v45 }
 0x12d   : > { %709 = vmatpush.bf16.msra.mxu2 %v1625_v46  ;;  %775 = vmatpush.bf16.msra.mxu0 %v1629_v47 }
 0x12e   : > { %850 = vmatpush.bf16.msra.mxu3 %v1635_v48 }
 0x131   : > { %710 = vmatpush.bf16.msra.mxu2 %v1624_v49  ;;  %776 = vmatpush.bf16.msra.mxu0 %v1628_v50 }
 0x132   : > { %851 = vmatpush.bf16.msra.mxu3 %v1634_v51 }
 0x13b   : > { %1472 = vmatmul.msk.bf16.vlgmr.msrb.gmra.mxu2 %vm467_vm0, %v505_v45  ;;  %1490 = vmatmul.msk.bf16.vlgmr.msrb.gmra.mxu0 %vm467_vm0, %v505_v45 }
 0x13c   : > { %1517 = vmatmul.msk.bf16.vlgmr.msrb.gmra.mxu3 %vm467_vm0, %v505_v45  ;;  %1535 = vmatmul.msk.bf16.vlgmr.msrb.gmra.mxu1 %vm467_vm0, %v505_v45 }
 0x13d   : > { %825 = vmatpush.bf16.msrb.mxu2 %v1633_v52 }
 0x141   : > { %826 = vmatpush.bf16.msrb.mxu2 %v1632_v53 }
 0x14b   : > { %1508 = vmatmul.msk.bf16.vlgmr.msra.gmra.mxu2 %vm467_vm0, %v505_v45  ;;  %1526 = vmatmul.msk.bf16.vlgmr.msra.gmra.mxu0 %vm467_vm0, %v505_v45 }
 0x14c   : > { %1553 = vmatmul.msk.bf16.vlgmr.msra.gmra.mxu3 %vm467_vm0, %v505_v45 }
 0x15b   : > { %1544 = vmatmul.msk.bf16.vlgmr.msrb.gmra.mxu2 %vm467_vm0, %v505_v45 }
 0x1a8   : > { %v546_v54 = vpop.f32.mrf.mxu0 }
 0x1a9   : > { %v687_v55 = vpop.f32.mrf.mxu1  ;;  %v857_v13 = vpack.c.bf16 %v546_v54, %v546_v54 }
 0x1aa   : > { %v862_v56 = vpack.c.bf16 %v687_v55, %v687_v55 }
 0x1ac   : > { %v889_v57 = vsel %vm865_vm5, %v862_v56, 0 }
 0x1ad   : > { %898 = vmatpush.bf16.xpose.msra.mxu1 %v889_v57 }
 0x1ae   : > { %v571_v58 = vpop.f32.mrf.mxu2 }
 0x1af   : > { %v621_v59 = vpop.f32.mrf.mxu3  ;;  %v858_v62 = vpack.c.bf16 %v571_v58, %v571_v58 }
 0x1b0   : > { %v548_v60 = vpop.f32.mrf.mxu0  ;;  %v860_v18 = vpack.c.bf16 %v621_v59, %v621_v59 }
 0x1b1   : > { %v689_v61 = vpop.f32.mrf.mxu1 }
 0x1b4   : > { %1555 = vmatmul.msk.bf16.vlgmr.msra.gmra.mxu1 %vm865_vm5, %v858_v62 }
 0x1b6   : > { %v573_v63 = vpop.f32.mrf.mxu2 }
 0x1b7   : > { %v623_v1 = vpop.f32.mrf.mxu3 }
 0x1b8   : > { %v662_v2 = vpop.f32.mrf.mxu0 }
 0x1b9   : > { %v861_v3 = vpack.c.bf16 %v662_v2, %v662_v2  ;;  %v803_v4 = vpop.f32.mrf.mxu1 }
 0x1ba   : > { %v991_v5 = vpack.c.bf16 %v803_v4, %v803_v4 }
 0x1bb   : > { %v870_v6 = vsel %vm865_vm5, %v861_v3, 0 }
 0x1bc   : > { %v1018_v7 = vsel %vm997_vm6, %v991_v5, 0  ;;  %879 = vmatpush.bf16.xpose.msrb.mxu0 %v870_v6 }
 0x1bd   : > { %1027 = vmatpush.bf16.msrb.mxu1 %v1018_v7 }
 0x1be   : > { %v596_v9 = vpop.f32.mrf.mxu2 }
 0x1bf   : > { %v737_v10 = vpop.f32.mrf.mxu3  ;;  %v859_v30 = vpack.c.bf16 %v596_v9, %v596_v9 }
 0x1c0   : > { %v864_v11 = vpack.c.bf16 %v737_v10, %v737_v10  ;;  %v664_v12 = vpop.f32.mrf.mxu0 }
 0x1c1   : > { %v805_v14 = vpop.f32.mrf.mxu1 }
 0x1c2   : > { %v927_v15 = vsel %vm865_vm5, %v864_v11, 0 }
 0x1c3   : > { %936 = vmatpush.bf16.xpose.msrb.mxu3 %v927_v15  ;;  %1554 = vmatmul.msk.bf16.vlgmr.msrb.gmra.mxu0 %vm865_vm5, %v857_v13 }
 0x1c6   : > { %v598_v16 = vpop.f32.mrf.mxu2 }
 0x1c7   : > { %v739_v17 = vpop.f32.mrf.mxu3 }
 0x1c8   : > { %v778_v19 = vpop.f32.mrf.mxu0 }
 0x1c9   : > { %v990_v20 = vpack.c.bf16 %v778_v19, %v778_v19 }
 0x1ca   : > { %1557 = vmatmul.msk.bf16.vlgmr.msrb.gmra.mxu3 %vm865_vm5, %v860_v18 }
 0x1cb   : > { %v999_v21 = vsel %vm997_vm6, %v990_v20, 0 }
 0x1cc   : > { %1008 = vmatpush.bf16.msra.mxu0 %v999_v21 }
 0x1ce   : > { %v712_v22 = vpop.f32.mrf.mxu2 }
 0x1cf   : > { %v863_v23 = vpack.c.bf16 %v712_v22, %v712_v22  ;;  %v853_v24 = vpop.f32.mrf.mxu3  ;;  %v1075_v22 = vld [vmem:[%s2153_s6] sm:$0xf] }
 0x1d0   : > { %v993_v25 = vpack.c.bf16 %v853_v24, %v853_v24  ;;  %v780_v26 = vpop.f32.mrf.mxu0 }
 0x1d1   : > { %v908_v27 = vsel %vm865_vm5, %v863_v23, 0  ;;  %v1083_v23 = vsel %vm997_vm6, %v1075_v22, 0  ;;  %v1077_v26 = vld [vmem:[%s2153_s6 + $0x8] sm:$0xf]  ;;  %v1691_v22 = vld [vmem:[%s2158_s11] ss:$0 sm:$0xff] }
 0x1d2   : > { %v1056_v28 = vsel %vm997_vm6, %v993_v25, 0  ;;  %917 = vmatpush.bf16.xpose.msra.mxu2 %v908_v27  ;;  %1092 = vmatpush.bf16.msrb.mxu0 %v1083_v23  ;;  %v1121_v27 = vsel %vm997_vm6, %v1077_v26, 0 }
 0x1d3   : > { %1065 = vmatpush.bf16.msra.mxu3 %v1056_v28  ;;  %v1076_v28 = vld [vmem:[%s2153_s6 + $0x4] sm:$0xf] }
 0x1d6   : > { %v714_v29 = vpop.f32.mrf.mxu2 }
 0x1d7   : > { %v855_v31 = vpop.f32.mrf.mxu3  ;;  %v1102_v29 = vsel %vm997_vm6, %v1076_v28, 0 }
 0x1d8   : > { %1111 = vmatpush.bf16.msra.mxu1 %v1102_v29 }
 0x1d9   : > { %1556 = vmatmul.msk.bf16.vlgmr.msra.gmra.mxu2 %vm865_vm5, %v859_v30  ;;  %v1078_v30 = vld [vmem:[%s2153_s6 + $0xc] sm:$0xf] }
 0x1da   : > { %v1140_v31 = vsel %vm997_vm6, %v1078_v30, 0 }
 0x1db   : > { %1149 = vmatpush.bf16.msrb.mxu3 %v1140_v31  ;;  %v1641_v31 = vld [vmem:[%s2159_s12 + $0x18] sm:$0xff] }
 0x1de   : > { %v828_v32 = vpop.f32.mrf.mxu2 }
 0x1df   : > { %v992_v33 = vpack.c.bf16 %v828_v32, %v828_v32 }
 0x1e1   : > { %v1037_v34 = vsel %vm997_vm6, %v992_v33, 0 }
 0x1e2   : > { %1046 = vmatpush.bf16.msrb.mxu2 %v1037_v34 }
 0x1e6   : > { %v830_v35 = vpop.f32.mrf.mxu2  ;;  %1130 = vmatpush.bf16.msra.mxu2 %v1121_v27  ;;  %v1642_v27 = vld [vmem:[%s2159_s12 + $0x20] sm:$0xff] }
 0x231   : > { %v900_v36 = vpop.f32.mrf.mxu1 }
 0x232   : > { %v945_v41 = vsel %vm865_vm5, %v900_v36, -inf }
 0x239   : > { %v902_v37 = vpop.f32.mrf.mxu1 }
 0x240   : > { %v881_v38 = vpop.f32.mrf.mxu0 }
 0x241   : > { %v942_v39 = vsel %vm865_vm5, %v881_v38, -inf }
 0x242   : > { %943 = vmax.xlane.f32.xlu2 %v942_v39 }
 0x248   : > { %v883_v40 = vpop.f32.mrf.mxu0 }
 0x24a   : > { %946 = vmax.xlane.f32.xlu2 %v945_v41 }
 0x24d   : > { %v938_v42 = vpop.f32.mrf.mxu3 }
 0x24e   : > { %v951_v47 = vsel %vm865_vm5, %v938_v42, -inf }
 0x255   : > { %v940_v43 = vpop.f32.mrf.mxu3 }
 0x25c   : > { %v919_v44 = vpop.f32.mrf.mxu2 }
 0x25d   : > { %v948_v45 = vsel %vm865_vm5, %v919_v44, -inf }
 0x25e   : > { %949 = vmax.xlane.f32.xlu1 %v948_v45 }
 0x264   : > { %v921_v46 = vpop.f32.mrf.mxu2 }
 0x266   : > { %952 = vmax.xlane.f32.xlu1 %v951_v47 }
 0x2b5   : > { %v944_v48 = vpop.xlane.xlu2 %943 }
 0x2b6   : > { %v954_v49 = vsub.f32 %v881_v38, %v944_v48 }
 0x2b8   : > { %v958_v50 = vmul.f32 1.442695, %v954_v49 }
 0x2ba   : > { %1697 = vpow2.f32 %v958_v50 }
 0x2bd   : > { %v947_v53 = vpop.xlane.xlu2 %946 }
 0x2be   : > { %v955_v56 = vsub.f32 %v900_v36, %v947_v53 }
 0x2c0   : > { %v1698_v51 = vpop.eup %1697  ;;  %v960_v58 = vmul.f32 1.442695, %v955_v56 }
 0x2c1   : > { %v966_v52 = vsel %vm865_vm5, %v1698_v51, 0.0 }
 0x2c2   : > { %967 = vadd.xlane.f32.xlu2 %v966_v52 }
 0x2d1   : > { %v950_v54 = vpop.xlane.xlu1 %949 }
 0x2d2   : > { %v956_v55 = vsub.f32 %v919_v44, %v950_v54  ;;  %v1688_v54 = vld [vmem:[%s2154_s7] ss:$0 sm:$0xff] }
 0x2d4   : > { %v962_v57 = vmul.f32 1.442695, %v956_v55 }
 0x2d6   : > { %1699 = vpow2.f32 %v962_v57 }
 0x2d7   : > { %1701 = vpow2.f32 %v960_v58 }
 0x2d9   : > { %v953_v59 = vpop.xlane.xlu1 %952 }
 0x2da   : > { %v957_v60 = vsub.f32 %v938_v42, %v953_v59 }
 0x2dc   : > { %v1700_v61 = vpop.eup %1699  ;;  %v964_v62 = vmul.f32 1.442695, %v957_v60 }
 0x2dd   : > { %v972_v63 = vsel %vm865_vm5, %v1700_v61, 0.0  ;;  %v1702_v1 = vpop.eup %1701 }
 0x2de   : > { %1703 = vpow2.f32 %v964_v62  ;;  %973 = vadd.xlane.f32.xlu0 %v972_v63  ;;  %v969_v4 = vsel %vm865_vm5, %v1702_v1, 0.0 }
 0x2e4   : > { %v1704_v2 = vpop.eup %1703 }
 0x2e5   : > { %v975_v3 = vsel %vm865_vm5, %v1704_v2, 0.0 }
 0x2e6   : > { %976 = vadd.xlane.f32.xlu1 %v975_v3  ;;  %970 = vadd.xlane.f32.xlu0 %v969_v4  ;;  %v1637_v3 = vld [vmem:[%s2157_s10 + $0x8] sm:$0xff] }
 0x335   : > { %v968_v5 = vpop.xlane.xlu2 %967 }
 0x336   : > { %1705 = vrcp.f32 %v968_v5 }
 0x33c   : > { %v1706_v6 = vpop.eup %1705 }
 0x33d   : > { %v982_v7 = vmul.f32 %v1706_v6, %v1698_v51 }
 0x33f   : > { %v986_v9 = vpack.c.bf16 %v982_v7, %v982_v7 }
 0x341   : > { %1558 = vmatmul.msk.bf16.vlgmr.msra.gmra.mxu0 %vm865_vm5, %v986_v9 }
 0x342   : > { %1230 = vmatpush.bf16.msra.mxu0 %v1637_v3 }
 0x351   : > { %v974_v10 = vpop.xlane.xlu0 %973 }
 0x352   : > { %1707 = vrcp.f32 %v974_v10 }
 0x358   : > { %v1708_v11 = vpop.eup %1707 }
 0x359   : > { %v984_v12 = vmul.f32 %v1708_v11, %v1700_v61  ;;  %v977_v13 = vpop.xlane.xlu1 %976  ;;  %v971_v14 = vpop.xlane.xlu0 %970 }
 0x35a   : > { %1709 = vrcp.f32 %v977_v13 }
 0x35b   : > { %v988_v15 = vpack.c.bf16 %v984_v12, %v984_v12  ;;  %1711 = vrcp.f32 %v971_v14  ;;  %v1689_v14 = vld [vmem:[%s2155_s8] ss:$0 sm:$0xff] }
 0x35d   : > { %1560 = vmatmul.msk.bf16.vlgmr.msrb.gmra.mxu2 %vm865_vm5, %v988_v15 }
 0x360   : > { %v1710_v16 = vpop.eup %1709 }
 0x361   : > { %v1712_v17 = vpop.eup %1711  ;;  %v985_v18 = vmul.f32 %v1710_v16, %v1704_v2 }
 0x362   : > { %v983_v19 = vmul.f32 %v1712_v17, %v1702_v1 }
 0x363   : > { %v989_v20 = vpack.c.bf16 %v985_v18, %v985_v18 }
 0x364   : > { %v987_v21 = vpack.c.bf16 %v983_v19, %v983_v19 }
 0x365   : > { %1561 = vmatmul.msk.bf16.vlgmr.msra.gmra.mxu3 %vm865_vm5, %v989_v20  ;;  %v1645_v20 = vld [vmem:[%s2159_s12 + $0x38] sm:$0xff] }
 0x366   : > { %1559 = vmatmul.msk.bf16.vlgmr.msrb.gmra.mxu1 %vm865_vm5, %v987_v21  ;;  %v1644_v21 = vld [vmem:[%s2159_s12 + $0x30] sm:$0xff] }
 0x367   : > { %1350 = vmatpush.bf16.msrb.mxu1 %v1645_v20 }
 0x36b   : > { %1351 = vmatpush.bf16.msrb.mxu1 %v1644_v21 }
 0x3be   : > { %v1010_v24 = vpop.f32.mrf.mxu0 }
 0x3bf   : > { %v1071_v25 = vpack.c.bf16 %v1010_v24, %v1010_v24  ;;  %v1643_v24 = vld [vmem:[%s2159_s12 + $0x28] sm:$0xff] }
 0x3c0   : > { %1352 = vmatpush.bf16.msrb.mxu1 %v1643_v24 }
 0x3c1   : > { %1562 = vmatmul.msk.bf16.vlgmr.msrb.gmra.mxu0 %vm865_vm5, %v1071_v25 }
 0x3c4   : > { %1353 = vmatpush.bf16.msrb.mxu1 %v1642_v27 }
 0x3c6   : > { %v1012_v32 = vpop.f32.mrf.mxu0 }
 0x3c8   : > { %1354 = vmatpush.bf16.msrb.mxu1 %v1641_v31 }
 0x3e0   : > { %v1048_v33 = vpop.f32.mrf.mxu2 }
 0x3e1   : > { %v1073_v34 = vpack.c.bf16 %v1048_v33, %v1048_v33 }
 0x3e3   : > { %v1029_v35 = vpop.f32.mrf.mxu1  ;;  %1564 = vmatmul.msk.bf16.vlgmr.msra.gmra.mxu2 %vm865_vm5, %v1073_v34 }
 0x3e4   : > { %v1072_v36 = vpack.c.bf16 %v1029_v35, %v1029_v35 }
 0x3e6   : > { %1563 = vmatmul.msk.bf16.vlgmr.msra.gmra.mxu1 %vm865_vm5, %v1072_v36  ;;  %v1640_v36 = vld [vmem:[%s2159_s12 + $0x10] sm:$0xff] }
 0x3e7   : > { %1355 = vmatpush.bf16.msrb.mxu1 %v1640_v36 }
 0x3e8   : > { %v1050_v37 = vpop.f32.mrf.mxu2  ;;  %v1067_v38 = vpop.f32.mrf.mxu3 }
 0x3e9   : > { %v1074_v39 = vpack.c.bf16 %v1067_v38, %v1067_v38 }
 0x3eb   : > { %v1031_v40 = vpop.f32.mrf.mxu1  ;;  %1565 = vmatmul.msk.bf16.vlgmr.msrb.gmra.mxu3 %vm865_vm5, %v1074_v39 }
 0x3f0   : > { %v1069_v41 = vpop.f32.mrf.mxu3 }
 0x3f1   : > { %v1639_v41 = vld [vmem:[%s2159_s12 + $0x8] sm:$0xff] }
 0x3f2   : > { %1356 = vmatpush.bf16.msrb.mxu1 %v1639_v41 }
 0x43e   : > { %v1094_v42 = vpop.f32.mrf.mxu0 }
 0x43f   : > { %v1155_v47 = vsel %vm467_vm0, %v1094_v42, 0.0 }
 0x446   : > { %v1096_v43 = vpop.f32.mrf.mxu0 }
 0x463   : > { %v1113_v44 = vpop.f32.mrf.mxu1 }
 0x464   : > { %v1156_v46 = vsel %vm467_vm0, %v1113_v44, 0.0 }
 0x465   : > { %v1157_v50 = vadd.f32 %v1156_v46, %v1155_v47 }
 0x466   : > { %v1132_v45 = vpop.f32.mrf.mxu2 }
 0x467   : > { %v1158_v48 = vsel %vm467_vm0, %v1132_v45, 0.0  ;;  %v1638_v45 = vld [vmem:[%s2159_s12] sm:$0xff] }
 0x468   : > { %v1159_v51 = vadd.f32 %v1158_v48, %v1157_v50  ;;  %1357 = vmatpush.bf16.msrb.mxu1 %v1638_v45 }
 0x46b   : > { %v1115_v49 = vpop.f32.mrf.mxu1 }
 0x46e   : > { %v1134_v52 = vpop.f32.mrf.mxu2  ;;  %v1151_v53 = vpop.f32.mrf.mxu3 }
 0x46f   : > { %v1160_v55 = vsel %vm467_vm0, %v1151_v53, 0.0 }
 0x470   : > { %v1161_v56 = vadd.f32 %v1160_v55, %v1159_v51 }
 0x472   : > { %v1166_v57 = vadd.f32 %v1688_v54, %v1161_v56 }
 0x474   : > { %v2062_v58 = vadd.f32 %v1166_v57, %v1910_v0  ;;  %v1636_v0 = vld [vmem:[%s2157_s10] sm:$0xff] }
 0x475   : > { %1231 = vmatpush.bf16.msra.mxu0 %v1636_v0 }
 0x476   : > { %v1153_v59 = vpop.f32.mrf.mxu3  ;;  %v1170_v60 = vsel %vm467_vm0, %v2062_v58, 0.0 }
 0x477   : > { %1171 = vadd.xlane.f32.xlu1 %v1170_v60 }
 0x4ea   : > { %v1172_v61 = vpop.xlane.xlu1 %1171 }
 0x4eb   : > { %v1173_v62 = vmul.f32 %v1172_v61, %v1914_v8 }
 0x4ed   : > { %v1174_v63 = vsub.f32 %v2062_v58, %v1173_v62 }
 0x4ef   : > { %v1175_v1 = vmul.f32 %v1174_v63, %v1174_v63 }
 0x4f1   : > { %v1176_v2 = vsel %vm467_vm0, %v1175_v1, 0.0 }
 0x4f2   : > { %1177 = vadd.xlane.f32.xlu2 %v1176_v2 }
 0x565   : > { %v1178_v4 = vpop.xlane.xlu2 %1177 }
 0x566   : > { %v1179_v5 = vmul.f32 %v1178_v4, %v1914_v8  ;;  %v1690_v8 = vld [vmem:[%s2156_s9] ss:$0 sm:$0xff] }
 0x568   : > { %v1180_v6 = vadd.f32 1e-05, %v1179_v5 }
 0x56a   : > { %1713 = vrsqrt.f32 %v1180_v6  ;;  %vm1187_vm8 = vweird.f32 %v1180_v6 }
 0x570   : > { %v1714_v7 = vpop.eup %1713 }
 0x571   : > { %v1182_v9 = vmul.f32 %v1714_v7, %v1180_v6  ;;  %vm1188_vm7 = vweird.f32 %v1714_v7 }
 0x572   : > { %vm1189_vm9 = vmor %vm1187_vm8, %vm1188_vm7 }
 0x573   : > { %v1183_v10 = vmul.f32 %v1714_v7, %v1182_v9 }
 0x575   : > { %v1184_v11 = vmul.f32 0.5, %v1183_v10  ;;  %v1692_v10 = vld [vmem:[%s2160_s13] ss:$0 sm:$0xff] }
 0x577   : > { %v1185_v12 = vsub.f32 1.5, %v1184_v11 }
 0x579   : > { %v1186_v13 = vmul.f32 %v1714_v7, %v1185_v12 }
 0x57b   : > { %v1190_v15 = vsel %vm1189_vm9, %v1714_v7, %v1186_v13 }
 0x57c   : > { %v1191_v16 = vmul.f32 %v1190_v15, %v1174_v63 }
 0x57e   : > { %v1195_v17 = vmul.f32 %v1689_v14, %v1191_v16 }
 0x580   : > { %v1199_v18 = vadd.f32 %v1690_v8, %v1195_v17 }
 0x582   : > { %v1200_v19 = vpack.c.bf16 %v1199_v18, %v1199_v18 }
 0x584   : > { %1574 = vmatmul.msk.bf16.vlgmr.msra.gmra.mxu0 %vm467_vm0, %v1200_v19 }
 0x601   : > { %v1233_v23 = vpop.f32.mrf.mxu0 }
 0x602   : > { %v1234_v25 = vadd.f32 %v1691_v22, %v1233_v23 }
 0x604   : > { %v1238_v26 = vmul.f32 0.70710677, %v1234_v25  ;;  %v1237_v5 = vmul.f32 0.5, %v1234_v25 }
 0x606   : > { %v1239_v28 = vmul.f32 %v1238_v26, %v1238_v26 }
 0x608   : > { %v1240_v29 = vmin.f32 %v1239_v28, 16.0 }
 0x609   : > { %v1235_v30 = vpop.f32.mrf.mxu0 }
 0x60a   : > { %v1241_v32 = vmul.f32 2.1237322e-06, %v1240_v29  ;;  %v1252_v33 = vmul.f32 3.8918573e-05, %v1240_v29 }
 0x60c   : > { %v1242_v34 = vadd.f32 0.00028619796, %v1241_v32  ;;  %v1253_v35 = vadd.f32 0.001143296, %v1252_v33 }
 0x60e   : > { %v1243_v37 = vmul.f32 %v1242_v34, %v1240_v29  ;;  %v1254_v38 = vmul.f32 %v1253_v35, %v1240_v29 }
 0x610   : > { %v1255_v39 = vadd.f32 0.014752088, %v1254_v38  ;;  %v1244_v40 = vadd.f32 0.0036580483, %v1243_v37 }
 0x612   : > { %v1256_v42 = vmul.f32 %v1255_v39, %v1240_v29  ;;  %v1245_v44 = vmul.f32 %v1244_v40, %v1240_v29 }
 0x614   : > { %v1257_v43 = vadd.f32 0.112945676, %v1256_v42  ;;  %v1246_v48 = vadd.f32 0.05243302, %v1245_v44 }
 0x616   : > { %v1258_v46 = vmul.f32 %v1257_v43, %v1240_v29  ;;  %v1247_v51 = vmul.f32 %v1246_v48, %v1240_v29 }
 0x618   : > { %v1259_v47 = vadd.f32 0.4994258, %v1258_v46  ;;  %v1248_v52 = vadd.f32 0.18741608, %v1247_v51 }
 0x61a   : > { %v1260_v49 = vmul.f32 %v1259_v47, %v1240_v29  ;;  %v1249_v54 = vmul.f32 %v1248_v52, %v1240_v29 }
 0x61c   : > { %v1261_v50 = vadd.f32 1.0, %v1260_v49  ;;  %v1250_v59 = vadd.f32 1.1283791, %v1249_v54 }
 0x61e   : > { %1715 = vrcp.f32 %v1261_v50  ;;  %v1273_v57 = vand.u32 2147483648, %v1261_v50  ;;  %v1271_v61 = vand.u32 2147483647, %v1261_v50  ;;  %vm1267_vm11 = vweird.f32 %v1261_v50 }
 0x61f   : > { %v1251_v1 = vmul.f32 %v1250_v59, %v1238_v26 }
 0x620   : > { %v1274_v63 = vor.u32 1.1754944e-38, %v1273_v57  ;;  %vm1272_vm13 = vcmp.eq.f32.partialorder %v1271_v61, 8.507059e+37 }
 0x624   : > { %v1716_v53 = vpop.eup %1715 }
 0x625   : > { %v1263_v55 = vmul.f32 %v1716_v53, %v1261_v50  ;;  %vm1268_vm10 = vweird.f32 %v1716_v53 }
 0x626   : > { %vm1269_vm12 = vmor %vm1267_vm11, %vm1268_vm10 }
 0x627   : > { %v1264_v56 = vsub.f32 1.0, %v1263_v55 }
 0x629   : > { %v1265_v60 = vmul.f32 %v1716_v53, %v1264_v56 }
 0x62b   : > { %v1266_v62 = vadd.f32 %v1716_v53, %v1265_v60 }
 0x62d   : > { %v1270_v2 = vsel %vm1269_vm12, %v1716_v53, %v1266_v62 }
 0x62e   : > { %v1275_v3 = vsel %vm1272_vm13, %v1274_v63, %v1270_v2 }
 0x62f   : > { %v1276_v0 = vmul.f32 %v1275_v3, %v1251_v1 }
 0x631   : > { %v1575_v4 = vclamps-f32 %v1276_v0, 1.0 }
 0x633   : > { %v1279_v6 = vadd.f32 1.0, %v1575_v4 }
 0x635   : > { %v1280_v7 = vmul.f32 %v1279_v6, %v1237_v5 }
 0x637   : > { %v1281_v9 = vpack.c.bf16 %v1280_v7, %v1280_v7 }
 0x639   : > { %1358 = vmatmul.bf16.vlgmr.msrb.gmra.mxu1 %v1281_v9 }
 0x6b6   : > { %v1359_v11 = vpop.f32.mrf.mxu1 }
 0x6b7   : > { %v1360_v12 = vadd.f32 %v1692_v10, %v1359_v11 }
 0x6b9   : > { %v1363_v13 = vadd.f32 %v1360_v12, %v2062_v58 }
 0x6bb   : > { %1364 = vst.msk [vmem:[%s458_s0] sm:$0xff] %vm467_vm0, %v1363_v13 }
 0x6bc   : > { %1744 = shalt.err (!%p1741_p3)
}
 0x6bd   : > { %1646 = dma.vmem_to_hbm [thread:$0]  (%p1895_p5), %s1379_s15, 128, %s1381_s1, %s1366_s17  }
 0x6be   : > { %v1361_v58 = vpop.f32.mrf.mxu1 }
 0x6bf PF: > { %p1652_p4 = scmp.ge.s32.totalorder %s1779_s16, 2  ;;  %s1392_s22 = sand.u32 1, %s1767_s29  }
 0x6c0   : > { %s1393_s28 = scalar_lea.sflag [#allocation3], %s1392_s22 }
 0x6c1   : > { %p1649_p7 = pnand %p1652_p4, %p1899_p6 }
 0x6c3   : > { %p1650_p8 = pneg %p1649_p7 }
 0x6c5   : > { %1762 = dma.done.wait (%p1650_p8), %s1393_s28, 128  }
 0x6c6   : > { %1764 = vsyncadd (%p1650_p8), %s1393_s28, 4294967168  ;;  %s2173_s2 = sld [smem:[#allocation5_spill]]  ;;  %p24_p9 = scmp.ge.s32.totalorder %s1882_s19, 4  }
 0x6c7   : > { %s2174_s15 = sld [smem:[#allocation6_spill]]  ;;  %s2175_s29 = smov %s1771_s30 }
 0x6c8   : > { %s2177_s16 = smov %s1882_s19  ;;  %26 = sbr.rel (!%p24_p9) target bundleno = 7 (0x7), region = 111 }
 0x6cc   : > { %s2176_s30 = smov %s2173_s2 }
 0x6cd   :  { %1399 = vsyncpa [#allocation3], 1 }
 0x6ce   :  { %1401 = vsyncpa [#allocation3 + $0x1], 1 }

// kernel: tpu_custom_call.1
= control target key start
LH: loop header
LB: loop body
LE: loop exit
PB: predicated region body
PF: predicated region fallthrough
CT: control target
= control target key end

     0   :  { %s2147_s0 = inlined_call_operand.vmem [shape: f32[2,8,32], index: 0, kind: input, shape index: {}]   ;;  %s2148_s1 = inlined_call_operand.vmem [shape: f32[1,32], index: 1, kind: input, shape index: {}]   ;;  %s2149_s2 = inlined_call_operand.vmem [shape: f32[1,32], index: 2, kind: input, shape index: {}]   ;;  %s2150_s3 = inlined_call_operand.vmem [shape: bf16[4,32,8], index: 3, kind: input, shape index: {}]   ;;  %s2151_s4 = inlined_call_operand.vmem [shape: bf16[4,32,8], index: 4, kind: input, shape index: {}]   ;;  %s2152_s5 = inlined_call_operand.vmem [shape: bf16[4,32,8], index: 5, kind: input, shape index: {}]   ;;  %s2153_s6 = inlined_call_operand.vmem [shape: bf16[4,8,32], index: 6, kind: input, shape index: {}]   ;;  %s2154_s7 = inlined_call_operand.vmem [shape: f32[1,32], index: 7, kind: input, shape index: {}]   ;;  %s2155_s8 = inlined_call_operand.vmem [shape: f32[1,32], index: 8, kind: input, shape index: {}]   ;;  %s2156_s9 = inlined_call_operand.vmem [shape: f32[1,32], index: 9, kind: input, shape index: {}]   ;;  %s2157_s10 = inlined_call_operand.vmem [shape: bf16[32,128], index: 10, kind: input, shape index: {}]   ;;  %s2158_s11 = inlined_call_operand.vmem [shape: f32[1,128], index: 11, kind: input, shape index: {}]   ;;  %s2159_s12 = inlined_call_operand.vmem [shape: bf16[128,32], index: 12, kind: input, shape index: {}]   ;;  %s2160_s13 = inlined_call_operand.vmem [shape: f32[1,32], index: 13, kind: input, shape index: {}]   ;;  %s2161_s14 = inlined_call_operand.hbm [shape: f32[2,8,32], index: 14, kind: output, shape index: {}]  }
   0x1   :  { %2163 = sst [smem:[#allocation7_spill]] %s2147_s0 }
   0x2   :  { %2164 = sst [smem:[#allocation8_spill]] %s2148_s1 }
   0x3   :  { %2165 = sst [smem:[#allocation9_spill]] %s2149_s2 }
   0x4   :  { %19 = vsyncpa [#allocation3], 0 }
   0x5   :  { %21 = vsyncpa [#allocation3 + $0x1], 0  ;;  %s1857_s29 = smov 0   ;;  %s1859_s30 = smov 0  }
   0x6   :  { %s1861_s15 = smov 0   ;;  %s1863_s16 = smov 0  }
   0x7 LB: > { %2166 = sst [smem:[#allocation5_spill]] %s1775_s15  ;;  %s1878_s17 = sadd.s32 4294967295, %s1779_s16   ;;  %s1779_s16 = sphi %s1863_s16, %s2177_s16   ;;  %s1775_s15 = sphi %s1861_s15, %s2174_s15   ;;  %s1771_s30 = sphi %s1859_s30, %s2176_s30   ;;  %s1767_s29 = sphi %s1857_s29, %s2175_s29  }
   0x8   : > { %s1440_s18 = sadd.s32 4294967294, %s1779_s16   ;;  %s1882_s19 = sadd.s32 1, %s1779_s16  }
   0x9   : > { %s333_s20 = sadd.s32 1, %s1775_s15  ;;  %s330_s21 = ssub.s32 %s1779_s16, %s1882_s19 }
   0xa   : > { %p343_p0 = scmp.ne.s32.totalorder %s1775_s15, %s1771_s30  ;;  %p331_p1 = scmp.eq.s32.totalorder %s330_s21, 0 }
   0xb   : > { %p344_p2 = scmp.eq.s32.totalorder %s1878_s17, 1  ;;  %p349_p3 = scmp.ne.s32.totalorder %s1771_s30, %s1767_s29 }
   0xc   : > { %p350_p4 = scmp.eq.s32.totalorder %s1440_s18, 1  ;;  %p1443_p7 = scmp.ge.s32.totalorder %s1779_s16, 1 }
   0xd   : > { %s1893_s22 = scalar_select %p331_p1, %s1775_s15, %s333_s20  }
   0xe   : > { %p1895_p5 = por %p344_p2, %p343_p0  ;;  %p1899_p6 = por %p350_p4, %p349_p3 }
   0xf   : > { %2167 = sst [smem:[#allocation6_spill]] %s1893_s22  ;;  %p414_p8 = scmp.lt.s32.totalorder %s1779_s16, 3 }
  0x11   : > { %p415_p9 = pnand %p1443_p7, %p414_p8 }
  0x12   : > { %p459_p10 = scmp.lt.s32.totalorder (!%p415_p9), %s1878_s17, 1  ;;  %s2170_s0 = sld [smem:[#allocation7_spill]] (!%p415_p9) }
  0x13   : > { %418 = sbr.rel (%p415_p9) target bundleno = 1727 (0x6bf), region = 76  ;;  %s2171_s1 = sld [smem:[#allocation8_spill]] (!%p415_p9) }
  0x14   : > { %s2172_s2 = sld [smem:[#allocation9_spill]] (!%p415_p9)  ;;  %s456_s22 = sand.u32 (!%p415_p9), 1, %s1771_s30  }
  0x15   : > { %s1609_s20 = sshll.u32 (!%p415_p9), %s1878_s17, 3 }
  0x16   : > { %s1376_s28 = scalar_lea.hbm (!%p415_p9), %s2161_s14, %s1609_s20 }
  0x18   : > { %s460_s25 = scalar_select %p459_p10, %s1878_s17, 1  ;;  %vm467_vm0 = vcmask 261120   ;;  %v1781_v2 = vmov 32.0   ;;  %v1613_v14 = vld [vmem:[%s2150_s3 + $0x8] sm:$0xff]  ;;  %v1615_v15 = vld [vmem:[%s2150_s3 + $0x18] sm:$0xff]  ;;  %v1612_v18 = vld [vmem:[%s2150_s3] sm:$0xff] }
  0x19   : > { %1693 = vrcp.f32 %v1781_v2  ;;  %v1619_v16 = vld [vmem:[%s2150_s3 + $0x38] sm:$0xff]  ;;  %543 = vmatpush.bf16.msra.mxu0 %v1613_v14  ;;  %568 = vmatpush.bf16.msra.mxu2 %v1615_v15  ;;  %v1614_v19 = vld [vmem:[%s2150_s3 + $0x10] sm:$0xff]  ;;  %v1617_v23 = vld [vmem:[%s2150_s3 + $0x28] sm:$0xff]  ;;  %vm865_vm5 = vcmask 64512   ;;  %vm997_vm6 = vcmask 1043456   ;;  %s1366_s17 = scalar_lea.sflag [#allocation3], %s456_s22 }
  0x1a   : > { %s1445_s26 = sshll.u32 %s460_s25, 3  ;;  %v1623_v17 = vld [vmem:[%s2151_s4 + $0x18] sm:$0xff]  ;;  %618 = vmatpush.bf16.msra.mxu3 %v1619_v16  ;;  %v1618_v20 = vld [vmem:[%s2150_s3 + $0x30] sm:$0xff]  ;;  %v1621_v24 = vld [vmem:[%s2151_s4 + $0x8] sm:$0xff] }
  0x1b   : > { %s462_s18 = scalar_lea.vmem %s2170_s0, %s1445_s26  ;;  %684 = vmatpush.bf16.msra.mxu1 %v1623_v17  ;;  %v1622_v21 = vld [vmem:[%s2151_s4 + $0x10] sm:$0xff]  ;;  %v1627_v25 = vld [vmem:[%s2151_s4 + $0x38] sm:$0xff]  ;;  %v1616_v28 = vld [vmem:[%s2150_s3 + $0x20] sm:$0xff] }
  0x1c   : > { %v1910_v0 = vld [vmem:[%s462_s18] sm:$0xff]  ;;  %v1631_v27 = vld [vmem:[%s2152_s5 + $0x18] sm:$0xff]  ;;  %v1626_v31 = vld [vmem:[%s2151_s4 + $0x30] sm:$0xff]  ;;  %s1444_s18 = sshll.u32 %s456_s22, 3 }
  0x1d   : > { %v468_v1 = vsel %vm467_vm0, %v1910_v0, 0.0  ;;  %544 = vmatpush.bf16.msra.mxu0 %v1612_v18  ;;  %569 = vmatpush.bf16.msra.mxu2 %v1614_v19  ;;  %v1620_v29 = vld [vmem:[%s2151_s4] sm:$0xff]  ;;  %v1630_v32 = vld [vmem:[%s2152_s5 + $0x10] sm:$0xff]  ;;  %v1625_v46 = vld [vmem:[%s2151_s4 + $0x28] sm:$0xff]  ;;  %s458_s0 = scalar_lea.vmem [#allocation2], %s1444_s18  ;;  %s1737_s18 = scalar_lea.hbm %s2161_s14, 16 }
  0x1e   : > { %469 = vadd.xlane.f32.xlu0 %v468_v1  ;;  %619 = vmatpush.bf16.msra.mxu3 %v1618_v20  ;;  %v1686_v39 = vld [vmem:[%s2171_s1] ss:$0 sm:$0xff]  ;;  %v1629_v47 = vld [vmem:[%s2152_s5 + $0x8] sm:$0xff]  ;;  %v1635_v48 = vld [vmem:[%s2152_s5 + $0x38] sm:$0xff]  ;;  %s1378_s15 = sshll.u32 %s458_s0, 4  ;;  %s1380_s1 = sshll.u32 %s1376_s28, 4  ;;  %s1379_s15 = int_to_ptr.vmem [resolvable:$true] %s1378_s15  ;;  %s1381_s1 = int_to_ptr.hbm [resolvable:$true] %s1380_s1 }
  0x1f   : > { %v1694_v3 = vpop.eup %1693  ;;  %685 = vmatpush.bf16.msra.mxu1 %v1622_v21  ;;  %v1687_v41 = vld [vmem:[%s2172_s2] ss:$0 sm:$0xff]  ;;  %v1634_v51 = vld [vmem:[%s2152_s5 + $0x30] sm:$0xff]  ;;  %v1633_v52 = vld [vmem:[%s2152_s5 + $0x28] sm:$0xff]  ;;  %s1731_s2 = sshra.s32 %s1381_s1, 4  ;;  %s1732_s2 = int_to_ptr.hbm [resolvable:$true] %s1731_s2 }
  0x20   : > { %v472_v4 = vmul.f32 32.0, %v1694_v3  ;;  %vm476_vm1 = vweird.f32 %v1694_v3  ;;  %v1624_v49 = vld [vmem:[%s2151_s4 + $0x20] sm:$0xff]  ;;  %s1733_s21 = scalar_lea.hbm %s1732_s2, 8  ;;  %p1738_p0 = scmp.lt.s32.totalorder %s1732_s2, %s2161_s14 }
  0x21   : > { %593 = vmatpush.bf16.msrb.mxu2 %v1617_v23  ;;  %659 = vmatpush.bf16.msrb.mxu0 %v1621_v24  ;;  %v1628_v50 = vld [vmem:[%s2152_s5] sm:$0xff]  ;;  %p1734_p11 = scmp.ne.s32.totalorder %s1732_s2, %s1733_s21  ;;  %p1739_p1 = scmp.lt.s32.totalorder %s1737_s18, %s1733_s21 }
  0x22   : > { %v473_v5 = vsub.f32 1.0, %v472_v4  ;;  %734 = vmatpush.bf16.msrb.mxu3 %v1627_v25  ;;  %v1632_v53 = vld [vmem:[%s2152_s5 + $0x20] sm:$0xff] }
  0x23   : > { %800 = vmatpush.bf16.msrb.mxu1 %v1631_v27  ;;  %p1735_p12 = pnand %p1734_p11, %p1895_p5  ;;  %p1740_p2 = por %p1739_p1, %p1738_p0 }
  0x24   : > { %v474_v6 = vmul.f32 %v1694_v3, %v473_v5 }
  0x25   : > { %594 = vmatpush.bf16.msrb.mxu2 %v1616_v28  ;;  %660 = vmatpush.bf16.msrb.mxu0 %v1620_v29  ;;  %p1736_p13 = pneg %p1735_p12 }
  0x26   : > { %v475_v7 = vadd.f32 %v1694_v3, %v474_v6  ;;  %735 = vmatpush.bf16.msrb.mxu3 %v1626_v31 }
  0x27   : > { %801 = vmatpush.bf16.msrb.mxu1 %v1630_v32  ;;  %p1741_p3 = pnand %p1740_p2, %p1736_p13 }
  0x28   : > { %v1914_v8 = vsel %vm476_vm1, %v1694_v3, %v475_v7 }
  0x91   : > { %v470_v9 = vpop.xlane.xlu0 %469 }
  0x92   : > { %v478_v10 = vmul.f32 %v1914_v8, %v470_v9 }
  0x94   : > { %v479_v11 = vsub.f32 %v1910_v0, %v478_v10 }
  0x96   : > { %v480_v12 = vmul.f32 %v479_v11, %v479_v11 }
  0x98   : > { %v481_v13 = vsel %vm467_vm0, %v480_v12, 0.0 }
  0x99   : > { %482 = vadd.xlane.f32.xlu0 %v481_v13 }
 0x10c   : > { %v483_v22 = vpop.xlane.xlu0 %482 }
 0x10d   : > { %v484_v26 = vmul.f32 %v483_v22, %v1914_v8 }
 0x10f   : > { %v485_v30 = vadd.f32 1e-05, %v484_v26 }
 0x111   : > { %1695 = vrsqrt.f32 %v485_v30  ;;  %vm492_vm3 = vweird.f32 %v485_v30 }
 0x117   : > { %v1696_v33 = vpop.eup %1695 }
 0x118   : > { %v487_v34 = vmul.f32 %v1696_v33, %v485_v30  ;;  %vm493_vm2 = vweird.f32 %v1696_v33 }
 0x119   : > { %vm494_vm4 = vmor %vm492_vm3, %vm493_vm2 }
 0x11a   : > { %v488_v35 = vmul.f32 %v1696_v33, %v487_v34 }
 0x11c   : > { %v489_v36 = vmul.f32 0.5, %v488_v35 }
 0x11e   : > { %v490_v37 = vsub.f32 1.5, %v489_v36 }
 0x120   : > { %v491_v38 = vmul.f32 %v1696_v33, %v490_v37 }
 0x122   : > { %v495_v40 = vsel %vm494_vm4, %v1696_v33, %v491_v38 }
 0x123   : > { %v496_v42 = vmul.f32 %v495_v40, %v479_v11 }
 0x125   : > { %v500_v43 = vmul.f32 %v1686_v39, %v496_v42 }
 0x127   : > { %v504_v44 = vadd.f32 %v1687_v41, %v500_v43 }
 0x129   : > { %v505_v45 = vpack.c.bf16 %v504_v44, %v504_v44 }
 0x12b   : > { %1454 = vmatmul.msk.bf16.vlgmr.msra.gmra.mxu0 %vm467_vm0, %v505_v45  ;;  %1463 = vmatmul.msk.bf16.vlgmr.msra.gmra.mxu2 %vm467_vm0, %v505_v45 }
 0x12c   : > { %1481 = vmatmul.msk.bf16.vlgmr.msra.gmra.mxu3 %vm467_vm0, %v505_v45  ;;  %1499 = vmatmul.msk.bf16.vlgmr.msra.gmra.mxu1 %vm467_vm0, %v505_v45 }
 0x12d   : > { %709 = vmatpush.bf16.msra.mxu2 %v1625_v46  ;;  %775 = vmatpush.bf16.msra.mxu0 %v1629_v47 }
 0x12e   : > { %850 = vmatpush.bf16.msra.mxu3 %v1635_v48 }
 0x131   : > { %710 = vmatpush.bf16.msra.mxu2 %v1624_v49  ;;  %776 = vmatpush.bf16.msra.mxu0 %v1628_v50 }
 0x132   : > { %851 = vmatpush.bf16.msra.mxu3 %v1634_v51 }
 0x13b   : > { %1472 = vmatmul.msk.bf16.vlgmr.msrb.gmra.mxu2 %vm467_vm0, %v505_v45  ;;  %1490 = vmatmul.msk.bf16.vlgmr.msrb.gmra.mxu0 %vm467_vm0, %v505_v45 }
 0x13c   : > { %1517 = vmatmul.msk.bf16.vlgmr.msrb.gmra.mxu3 %vm467_vm0, %v505_v45  ;;  %1535 = vmatmul.msk.bf16.vlgmr.msrb.gmra.mxu1 %vm467_vm0, %v505_v45 }
 0x13d   : > { %825 = vmatpush.bf16.msrb.mxu2 %v1633_v52 }
 0x141   : > { %826 = vmatpush.bf16.msrb.mxu2 %v1632_v53 }
 0x14b   : > { %1508 = vmatmul.msk.bf16.vlgmr.msra.gmra.mxu2 %vm467_vm0, %v505_v45  ;;  %1526 = vmatmul.msk.bf16.vlgmr.msra.gmra.mxu0 %vm467_vm0, %v505_v45 }
 0x14c   : > { %1553 = vmatmul.msk.bf16.vlgmr.msra.gmra.mxu3 %vm467_vm0, %v505_v45 }
 0x15b   : > { %1544 = vmatmul.msk.bf16.vlgmr.msrb.gmra.mxu2 %vm467_vm0, %v505_v45 }
 0x1a8   : > { %v546_v54 = vpop.f32.mrf.mxu0 }
 0x1a9   : > { %v687_v55 = vpop.f32.mrf.mxu1  ;;  %v857_v13 = vpack.c.bf16 %v546_v54, %v546_v54 }
 0x1aa   : > { %v862_v56 = vpack.c.bf16 %v687_v55, %v687_v55 }
 0x1ac   : > { %v889_v57 = vsel %vm865_vm5, %v862_v56, 0 }
 0x1ad   : > { %898 = vmatpush.bf16.xpose.msra.mxu1 %v889_v57 }
 0x1ae   : > { %v571_v58 = vpop.f32.mrf.mxu2 }
 0x1af   : > { %v621_v59 = vpop.f32.mrf.mxu3  ;;  %v858_v62 = vpack.c.bf16 %v571_v58, %v571_v58 }
 0x1b0   : > { %v548_v60 = vpop.f32.mrf.mxu0  ;;  %v860_v18 = vpack.c.bf16 %v621_v59, %v621_v59 }
 0x1b1   : > { %v689_v61 = vpop.f32.mrf.mxu1 }
 0x1b4   : > { %1555 = vmatmul.msk.bf16.vlgmr.msra.gmra.mxu1 %vm865_vm5, %v858_v62 }
 0x1b6   : > { %v573_v63 = vpop.f32.mrf.mxu2 }
 0x1b7   : > { %v623_v1 = vpop.f32.mrf.mxu3 }
 0x1b8   : > { %v662_v2 = vpop.f32.mrf.mxu0 }
 0x1b9   : > { %v861_v3 = vpack.c.bf16 %v662_v2, %v662_v2  ;;  %v803_v4 = vpop.f32.mrf.mxu1 }
 0x1ba   : > { %v991_v5 = vpack.c.bf16 %v803_v4, %v803_v4 }
 0x1bb   : > { %v870_v6 = vsel %vm865_vm5, %v861_v3, 0 }
 0x1bc   : > { %v1018_v7 = vsel %vm997_vm6, %v991_v5, 0  ;;  %879 = vmatpush.bf16.xpose.msrb.mxu0 %v870_v6 }
 0x1bd   : > { %1027 = vmatpush.bf16.msrb.mxu1 %v1018_v7 }
 0x1be   : > { %v596_v9 = vpop.f32.mrf.mxu2 }
 0x1bf   : > { %v737_v10 = vpop.f32.mrf.mxu3  ;;  %v859_v30 = vpack.c.bf16 %v596_v9, %v596_v9 }
 0x1c0   : > { %v864_v11 = vpack.c.bf16 %v737_v10, %v737_v10  ;;  %v664_v12 = vpop.f32.mrf.mxu0 }
 0x1c1   : > { %v805_v14 = vpop.f32.mrf.mxu1 }
 0x1c2   : > { %v927_v15 = vsel %vm865_vm5, %v864_v11, 0 }
 0x1c3   : > { %936 = vmatpush.bf16.xpose.msrb.mxu3 %v927_v15  ;;  %1554 = vmatmul.msk.bf16.vlgmr.msrb.gmra.mxu0 %vm865_vm5, %v857_v13 }
 0x1c6   : > { %v598_v16 = vpop.f32.mrf.mxu2 }
 0x1c7   : > { %v739_v17 = vpop.f32.mrf.mxu3 }
 0x1c8   : > { %v778_v19 = vpop.f32.mrf.mxu0 }
 0x1c9   : > { %v990_v20 = vpack.c.bf16 %v778_v19, %v778_v19 }
 0x1ca   : > { %1557 = vmatmul.msk.bf16.vlgmr.msrb.gmra.mxu3 %vm865_vm5, %v860_v18 }
 0x1cb   : > { %v999_v21 = vsel %vm997_vm6, %v990_v20, 0 }
 0x1cc   : > { %1008 = vmatpush.bf16.msra.mxu0 %v999_v21 }
 0x1ce   : > { %v712_v22 = vpop.f32.mrf.mxu2 }
 0x1cf   : > { %v863_v23 = vpack.c.bf16 %v712_v22, %v712_v22  ;;  %v853_v24 = vpop.f32.mrf.mxu3  ;;  %v1075_v22 = vld [vmem:[%s2153_s6] sm:$0xf] }
 0x1d0   : > { %v993_v25 = vpack.c.bf16 %v853_v24, %v853_v24  ;;  %v780_v26 = vpop.f32.mrf.mxu0 }
 0x1d1   : > { %v908_v27 = vsel %vm865_vm5, %v863_v23, 0  ;;  %v1083_v23 = vsel %vm997_vm6, %v1075_v22, 0  ;;  %v1077_v26 = vld [vmem:[%s2153_s6 + $0x8] sm:$0xf]  ;;  %v1691_v22 = vld [vmem:[%s2158_s11] ss:$0 sm:$0xff] }
 0x1d2   : > { %v1056_v28 = vsel %vm997_vm6, %v993_v25, 0  ;;  %917 = vmatpush.bf16.xpose.msra.mxu2 %v908_v27  ;;  %1092 = vmatpush.bf16.msrb.mxu0 %v1083_v23  ;;  %v1121_v27 = vsel %vm997_vm6, %v1077_v26, 0 }
 0x1d3   : > { %1065 = vmatpush.bf16.msra.mxu3 %v1056_v28  ;;  %v1076_v28 = vld [vmem:[%s2153_s6 + $0x4] sm:$0xf] }
 0x1d6   : > { %v714_v29 = vpop.f32.mrf.mxu2 }
 0x1d7   : > { %v855_v31 = vpop.f32.mrf.mxu3  ;;  %v1102_v29 = vsel %vm997_vm6, %v1076_v28, 0 }
 0x1d8   : > { %1111 = vmatpush.bf16.msra.mxu1 %v1102_v29 }
 0x1d9   : > { %1556 = vmatmul.msk.bf16.vlgmr.msra.gmra.mxu2 %vm865_vm5, %v859_v30  ;;  %v1078_v30 = vld [vmem:[%s2153_s6 + $0xc] sm:$0xf] }
 0x1da   : > { %v1140_v31 = vsel %vm997_vm6, %v1078_v30, 0 }
 0x1db   : > { %1149 = vmatpush.bf16.msrb.mxu3 %v1140_v31  ;;  %v1641_v31 = vld [vmem:[%s2159_s12 + $0x18] sm:$0xff] }
 0x1de   : > { %v828_v32 = vpop.f32.mrf.mxu2 }
 0x1df   : > { %v992_v33 = vpack.c.bf16 %v828_v32, %v828_v32 }
 0x1e1   : > { %v1037_v34 = vsel %vm997_vm6, %v992_v33, 0 }
 0x1e2   : > { %1046 = vmatpush.bf16.msrb.mxu2 %v1037_v34 }
 0x1e6   : > { %v830_v35 = vpop.f32.mrf.mxu2  ;;  %1130 = vmatpush.bf16.msra.mxu2 %v1121_v27  ;;  %v1642_v27 = vld [vmem:[%s2159_s12 + $0x20] sm:$0xff] }
 0x231   : > { %v900_v36 = vpop.f32.mrf.mxu1 }
 0x232   : > { %v945_v41 = vsel %vm865_vm5, %v900_v36, -inf }
 0x239   : > { %v902_v37 = vpop.f32.mrf.mxu1 }
 0x240   : > { %v881_v38 = vpop.f32.mrf.mxu0 }
 0x241   : > { %v942_v39 = vsel %vm865_vm5, %v881_v38, -inf }
 0x242   : > { %943 = vmax.xlane.f32.xlu2 %v942_v39 }
 0x248   : > { %v883_v40 = vpop.f32.mrf.mxu0 }
 0x24a   : > { %946 = vmax.xlane.f32.xlu2 %v945_v41 }
 0x24d   : > { %v938_v42 = vpop.f32.mrf.mxu3 }
 0x24e   : > { %v951_v47 = vsel %vm865_vm5, %v938_v42, -inf }
 0x255   : > { %v940_v43 = vpop.f32.mrf.mxu3 }
 0x25c   : > { %v919_v44 = vpop.f32.mrf.mxu2 }
 0x25d   : > { %v948_v45 = vsel %vm865_vm5, %v919_v44, -inf }
 0x25e   : > { %949 = vmax.xlane.f32.xlu1 %v948_v45 }
 0x264   : > { %v921_v46 = vpop.f32.mrf.mxu2 }
 0x266   : > { %952 = vmax.xlane.f32.xlu1 %v951_v47 }
 0x2b5   : > { %v944_v48 = vpop.xlane.xlu2 %943 }
 0x2b6   : > { %v954_v49 = vsub.f32 %v881_v38, %v944_v48 }
 0x2b8   : > { %v958_v50 = vmul.f32 1.442695, %v954_v49 }
 0x2ba   : > { %1697 = vpow2.f32 %v958_v50 }
 0x2bd   : > { %v947_v53 = vpop.xlane.xlu2 %946 }
 0x2be   : > { %v955_v56 = vsub.f32 %v900_v36, %v947_v53 }
 0x2c0   : > { %v1698_v51 = vpop.eup %1697  ;;  %v960_v58 = vmul.f32 1.442695, %v955_v56 }
 0x2c1   : > { %v966_v52 = vsel %vm865_vm5, %v1698_v51, 0.0 }
 0x2c2   : > { %967 = vadd.xlane.f32.xlu2 %v966_v52 }
 0x2d1   : > { %v950_v54 = vpop.xlane.xlu1 %949 }
 0x2d2   : > { %v956_v55 = vsub.f32 %v919_v44, %v950_v54  ;;  %v1688_v54 = vld [vmem:[%s2154_s7] ss:$0 sm:$0xff] }
 0x2d4   : > { %v962_v57 = vmul.f32 1.442695, %v956_v55 }
 0x2d6   : > { %1699 = vpow2.f32 %v962_v57 }
 0x2d7   : > { %1701 = vpow2.f32 %v960_v58 }
 0x2d9   : > { %v953_v59 = vpop.xlane.xlu1 %952 }
 0x2da   : > { %v957_v60 = vsub.f32 %v938_v42, %v953_v59 }
 0x2dc   : > { %v1700_v61 = vpop.eup %1699  ;;  %v964_v62 = vmul.f32 1.442695, %v957_v60 }
 0x2dd   : > { %v972_v63 = vsel %vm865_vm5, %v1700_v61, 0.0  ;;  %v1702_v1 = vpop.eup %1701 }
 0x2de   : > { %1703 = vpow2.f32 %v964_v62  ;;  %973 = vadd.xlane.f32.xlu0 %v972_v63  ;;  %v969_v4 = vsel %vm865_vm5, %v1702_v1, 0.0 }
 0x2e4   : > { %v1704_v2 = vpop.eup %1703 }
 0x2e5   : > { %v975_v3 = vsel %vm865_vm5, %v1704_v2, 0.0 }
 0x2e6   : > { %976 = vadd.xlane.f32.xlu1 %v975_v3  ;;  %970 = vadd.xlane.f32.xlu0 %v969_v4  ;;  %v1637_v3 = vld [vmem:[%s2157_s10 + $0x8] sm:$0xff] }
 0x335   : > { %v968_v5 = vpop.xlane.xlu2 %967 }
 0x336   : > { %1705 = vrcp.f32 %v968_v5 }
 0x33c   : > { %v1706_v6 = vpop.eup %1705 }
 0x33d   : > { %v982_v7 = vmul.f32 %v1706_v6, %v1698_v51 }
 0x33f   : > { %v986_v9 = vpack.c.bf16 %v982_v7, %v982_v7 }
 0x341   : > { %1558 = vmatmul.msk.bf16.vlgmr.msra.gmra.mxu0 %vm865_vm5, %v986_v9 }
 0x342   : > { %1230 = vmatpush.bf16.msra.mxu0 %v1637_v3 }
 0x351   : > { %v974_v10 = vpop.xlane.xlu0 %973 }
 0x352   : > { %1707 = vrcp.f32 %v974_v10 }
 0x358   : > { %v1708_v11 = vpop.eup %1707 }
 0x359   : > { %v984_v12 = vmul.f32 %v1708_v11, %v1700_v61  ;;  %v977_v13 = vpop.xlane.xlu1 %976  ;;  %v971_v14 = vpop.xlane.xlu0 %970 }
 0x35a   : > { %1709 = vrcp.f32 %v977_v13 }
 0x35b   : > { %v988_v15 = vpack.c.bf16 %v984_v12, %v984_v12  ;;  %1711 = vrcp.f32 %v971_v14  ;;  %v1689_v14 = vld [vmem:[%s2155_s8] ss:$0 sm:$0xff] }
 0x35d   : > { %1560 = vmatmul.msk.bf16.vlgmr.msrb.gmra.mxu2 %vm865_vm5, %v988_v15 }
 0x360   : > { %v1710_v16 = vpop.eup %1709 }
 0x361   : > { %v1712_v17 = vpop.eup %1711  ;;  %v985_v18 = vmul.f32 %v1710_v16, %v1704_v2 }
 0x362   : > { %v983_v19 = vmul.f32 %v1712_v17, %v1702_v1 }
 0x363   : > { %v989_v20 = vpack.c.bf16 %v985_v18, %v985_v18 }
 0x364   : > { %v987_v21 = vpack.c.bf16 %v983_v19, %v983_v19 }
 0x365   : > { %1561 = vmatmul.msk.bf16.vlgmr.msra.gmra.mxu3 %vm865_vm5, %v989_v20  ;;  %v1645_v20 = vld [vmem:[%s2159_s12 + $0x38] sm:$0xff] }
 0x366   : > { %1559 = vmatmul.msk.bf16.vlgmr.msrb.gmra.mxu1 %vm865_vm5, %v987_v21  ;;  %v1644_v21 = vld [vmem:[%s2159_s12 + $0x30] sm:$0xff] }
 0x367   : > { %1350 = vmatpush.bf16.msrb.mxu1 %v1645_v20 }
 0x36b   : > { %1351 = vmatpush.bf16.msrb.mxu1 %v1644_v21 }
 0x3be   : > { %v1010_v24 = vpop.f32.mrf.mxu0 }
 0x3bf   : > { %v1071_v25 = vpack.c.bf16 %v1010_v24, %v1010_v24  ;;  %v1643_v24 = vld [vmem:[%s2159_s12 + $0x28] sm:$0xff] }
 0x3c0   : > { %1352 = vmatpush.bf16.msrb.mxu1 %v1643_v24 }
 0x3c1   : > { %1562 = vmatmul.msk.bf16.vlgmr.msrb.gmra.mxu0 %vm865_vm5, %v1071_v25 }
 0x3c4   : > { %1353 = vmatpush.bf16.msrb.mxu1 %v1642_v27 }
 0x3c6   : > { %v1012_v32 = vpop.f32.mrf.mxu0 }
 0x3c8   : > { %1354 = vmatpush.bf16.msrb.mxu1 %v1641_v31 }
 0x3e0   : > { %v1048_v33 = vpop.f32.mrf.mxu2 }
 0x3e1   : > { %v1073_v34 = vpack.c.bf16 %v1048_v33, %v1048_v33 }
 0x3e3   : > { %v1029_v35 = vpop.f32.mrf.mxu1  ;;  %1564 = vmatmul.msk.bf16.vlgmr.msra.gmra.mxu2 %vm865_vm5, %v1073_v34 }
 0x3e4   : > { %v1072_v36 = vpack.c.bf16 %v1029_v35, %v1029_v35 }
 0x3e6   : > { %1563 = vmatmul.msk.bf16.vlgmr.msra.gmra.mxu1 %vm865_vm5, %v1072_v36  ;;  %v1640_v36 = vld [vmem:[%s2159_s12 + $0x10] sm:$0xff] }
 0x3e7   : > { %1355 = vmatpush.bf16.msrb.mxu1 %v1640_v36 }
 0x3e8   : > { %v1050_v37 = vpop.f32.mrf.mxu2  ;;  %v1067_v38 = vpop.f32.mrf.mxu3 }
 0x3e9   : > { %v1074_v39 = vpack.c.bf16 %v1067_v38, %v1067_v38 }
 0x3eb   : > { %v1031_v40 = vpop.f32.mrf.mxu1  ;;  %1565 = vmatmul.msk.bf16.vlgmr.msrb.gmra.mxu3 %vm865_vm5, %v1074_v39 }
 0x3f0   : > { %v1069_v41 = vpop.f32.mrf.mxu3 }
 0x3f1   : > { %v1639_v41 = vld [vmem:[%s2159_s12 + $0x8] sm:$0xff] }
 0x3f2   : > { %1356 = vmatpush.bf16.msrb.mxu1 %v1639_v41 }
 0x43e   : > { %v1094_v42 = vpop.f32.mrf.mxu0 }
 0x43f   : > { %v1155_v47 = vsel %vm467_vm0, %v1094_v42, 0.0 }
 0x446   : > { %v1096_v43 = vpop.f32.mrf.mxu0 }
 0x463   : > { %v1113_v44 = vpop.f32.mrf.mxu1 }
 0x464   : > { %v1156_v46 = vsel %vm467_vm0, %v1113_v44, 0.0 }
 0x465   : > { %v1157_v50 = vadd.f32 %v1156_v46, %v1155_v47 }
 0x466   : > { %v1132_v45 = vpop.f32.mrf.mxu2 }
 0x467   : > { %v1158_v48 = vsel %vm467_vm0, %v1132_v45, 0.0  ;;  %v1638_v45 = vld [vmem:[%s2159_s12] sm:$0xff] }
 0x468   : > { %v1159_v51 = vadd.f32 %v1158_v48, %v1157_v50  ;;  %1357 = vmatpush.bf16.msrb.mxu1 %v1638_v45 }
 0x46b   : > { %v1115_v49 = vpop.f32.mrf.mxu1 }
 0x46e   : > { %v1134_v52 = vpop.f32.mrf.mxu2  ;;  %v1151_v53 = vpop.f32.mrf.mxu3 }
 0x46f   : > { %v1160_v55 = vsel %vm467_vm0, %v1151_v53, 0.0 }
 0x470   : > { %v1161_v56 = vadd.f32 %v1160_v55, %v1159_v51 }
 0x472   : > { %v1166_v57 = vadd.f32 %v1688_v54, %v1161_v56 }
 0x474   : > { %v2062_v58 = vadd.f32 %v1166_v57, %v1910_v0  ;;  %v1636_v0 = vld [vmem:[%s2157_s10] sm:$0xff] }
 0x475   : > { %1231 = vmatpush.bf16.msra.mxu0 %v1636_v0 }
 0x476   : > { %v1153_v59 = vpop.f32.mrf.mxu3  ;;  %v1170_v60 = vsel %vm467_vm0, %v2062_v58, 0.0 }
 0x477   : > { %1171 = vadd.xlane.f32.xlu1 %v1170_v60 }
 0x4ea   : > { %v1172_v61 = vpop.xlane.xlu1 %1171 }
 0x4eb   : > { %v1173_v62 = vmul.f32 %v1172_v61, %v1914_v8 }
 0x4ed   : > { %v1174_v63 = vsub.f32 %v2062_v58, %v1173_v62 }
 0x4ef   : > { %v1175_v1 = vmul.f32 %v1174_v63, %v1174_v63 }
 0x4f1   : > { %v1176_v2 = vsel %vm467_vm0, %v1175_v1, 0.0 }
 0x4f2   : > { %1177 = vadd.xlane.f32.xlu2 %v1176_v2 }
 0x565   : > { %v1178_v4 = vpop.xlane.xlu2 %1177 }
 0x566   : > { %v1179_v5 = vmul.f32 %v1178_v4, %v1914_v8  ;;  %v1690_v8 = vld [vmem:[%s2156_s9] ss:$0 sm:$0xff] }
 0x568   : > { %v1180_v6 = vadd.f32 1e-05, %v1179_v5 }
 0x56a   : > { %1713 = vrsqrt.f32 %v1180_v6  ;;  %vm1187_vm8 = vweird.f32 %v1180_v6 }
 0x570   : > { %v1714_v7 = vpop.eup %1713 }
 0x571   : > { %v1182_v9 = vmul.f32 %v1714_v7, %v1180_v6  ;;  %vm1188_vm7 = vweird.f32 %v1714_v7 }
 0x572   : > { %vm1189_vm9 = vmor %vm1187_vm8, %vm1188_vm7 }
 0x573   : > { %v1183_v10 = vmul.f32 %v1714_v7, %v1182_v9 }
 0x575   : > { %v1184_v11 = vmul.f32 0.5, %v1183_v10  ;;  %v1692_v10 = vld [vmem:[%s2160_s13] ss:$0 sm:$0xff] }
 0x577   : > { %v1185_v12 = vsub.f32 1.5, %v1184_v11 }
 0x579   : > { %v1186_v13 = vmul.f32 %v1714_v7, %v1185_v12 }
 0x57b   : > { %v1190_v15 = vsel %vm1189_vm9, %v1714_v7, %v1186_v13 }
 0x57c   : > { %v1191_v16 = vmul.f32 %v1190_v15, %v1174_v63 }
 0x57e   : > { %v1195_v17 = vmul.f32 %v1689_v14, %v1191_v16 }
 0x580   : > { %v1199_v18 = vadd.f32 %v1690_v8, %v1195_v17 }
 0x582   : > { %v1200_v19 = vpack.c.bf16 %v1199_v18, %v1199_v18 }
 0x584   : > { %1574 = vmatmul.msk.bf16.vlgmr.msra.gmra.mxu0 %vm467_vm0, %v1200_v19 }
 0x601   : > { %v1233_v23 = vpop.f32.mrf.mxu0 }
 0x602   : > { %v1234_v25 = vadd.f32 %v1691_v22, %v1233_v23 }
 0x604   : > { %v1238_v26 = vmul.f32 0.70710677, %v1234_v25  ;;  %v1237_v5 = vmul.f32 0.5, %v1234_v25 }
 0x606   : > { %v1239_v28 = vmul.f32 %v1238_v26, %v1238_v26 }
 0x608   : > { %v1240_v29 = vmin.f32 %v1239_v28, 16.0 }
 0x609   : > { %v1235_v30 = vpop.f32.mrf.mxu0 }
 0x60a   : > { %v1241_v32 = vmul.f32 2.1237322e-06, %v1240_v29  ;;  %v1252_v33 = vmul.f32 3.8918573e-05, %v1240_v29 }
 0x60c   : > { %v1242_v34 = vadd.f32 0.00028619796, %v1241_v32  ;;  %v1253_v35 = vadd.f32 0.001143296, %v1252_v33 }
 0x60e   : > { %v1243_v37 = vmul.f32 %v1242_v34, %v1240_v29  ;;  %v1254_v38 = vmul.f32 %v1253_v35, %v1240_v29 }
 0x610   : > { %v1255_v39 = vadd.f32 0.014752088, %v1254_v38  ;;  %v1244_v40 = vadd.f32 0.0036580483, %v1243_v37 }
 0x612   : > { %v1256_v42 = vmul.f32 %v1255_v39, %v1240_v29  ;;  %v1245_v44 = vmul.f32 %v1244_v40, %v1240_v29 }
 0x614   : > { %v1257_v43 = vadd.f32 0.112945676, %v1256_v42  ;;  %v1246_v48 = vadd.f32 0.05243302, %v1245_v44 }
 0x616   : > { %v1258_v46 = vmul.f32 %v1257_v43, %v1240_v29  ;;  %v1247_v51 = vmul.f32 %v1246_v48, %v1240_v29 }
 0x618   : > { %v1259_v47 = vadd.f32 0.4994258, %v1258_v46  ;;  %v1248_v52 = vadd.f32 0.18741608, %v1247_v51 }
 0x61a   : > { %v1260_v49 = vmul.f32 %v1259_v47, %v1240_v29  ;;  %v1249_v54 = vmul.f32 %v1248_v52, %v1240_v29 }
 0x61c   : > { %v1261_v50 = vadd.f32 1.0, %v1260_v49  ;;  %v1250_v59 = vadd.f32 1.1283791, %v1249_v54 }
 0x61e   : > { %1715 = vrcp.f32 %v1261_v50  ;;  %v1273_v57 = vand.u32 2147483648, %v1261_v50  ;;  %v1271_v61 = vand.u32 2147483647, %v1261_v50  ;;  %vm1267_vm11 = vweird.f32 %v1261_v50 }
 0x61f   : > { %v1251_v1 = vmul.f32 %v1250_v59, %v1238_v26 }
 0x620   : > { %v1274_v63 = vor.u32 1.1754944e-38, %v1273_v57  ;;  %vm1272_vm13 = vcmp.eq.f32.partialorder %v1271_v61, 8.507059e+37 }
 0x624   : > { %v1716_v53 = vpop.eup %1715 }
 0x625   : > { %v1263_v55 = vmul.f32 %v1716_v53, %v1261_v50  ;;  %vm1268_vm10 = vweird.f32 %v1716_v53 }
 0x626   : > { %vm1269_vm12 = vmor %vm1267_vm11, %vm1268_vm10 }
 0x627   : > { %v1264_v56 = vsub.f32 1.0, %v1263_v55 }
 0x629   : > { %v1265_v60 = vmul.f32 %v1716_v53, %v1264_v56 }
 0x62b   : > { %v1266_v62 = vadd.f32 %v1716_v53, %v1265_v60 }
 0x62d   : > { %v1270_v2 = vsel %vm1269_vm12, %v1716_v53, %v1266_v62 }
 0x62e   : > { %v1275_v3 = vsel %vm1272_vm13, %v1274_v63, %v1270_v2 }
 0x62f   : > { %v1276_v0 = vmul.f32 %v1275_v3, %v1251_v1 }
 0x631   : > { %v1575_v4 = vclamps-f32 %v1276_v0, 1.0 }
 0x633   : > { %v1279_v6 = vadd.f32 1.0, %v1575_v4 }
 0x635   : > { %v1280_v7 = vmul.f32 %v1279_v6, %v1237_v5 }
 0x637   : > { %v1281_v9 = vpack.c.bf16 %v1280_v7, %v1280_v7 }
 0x639   : > { %1358 = vmatmul.bf16.vlgmr.msrb.gmra.mxu1 %v1281_v9 }
 0x6b6   : > { %v1359_v11 = vpop.f32.mrf.mxu1 }
 0x6b7   : > { %v1360_v12 = vadd.f32 %v1692_v10, %v1359_v11 }
 0x6b9   : > { %v1363_v13 = vadd.f32 %v1360_v12, %v2062_v58 }
 0x6bb   : > { %1364 = vst.msk [vmem:[%s458_s0] sm:$0xff] %vm467_vm0, %v1363_v13 }
 0x6bc   : > { %1744 = shalt.err (!%p1741_p3)
}
 0x6bd   : > { %1646 = dma.vmem_to_hbm [thread:$0]  (%p1895_p5), %s1379_s15, 128, %s1381_s1, %s1366_s17  }
 0x6be   : > { %v1361_v58 = vpop.f32.mrf.mxu1 }
 0x6bf PF: > { %p1652_p4 = scmp.ge.s32.totalorder %s1779_s16, 2  ;;  %s1392_s22 = sand.u32 1, %s1767_s29  }
 0x6c0   : > { %s1393_s28 = scalar_lea.sflag [#allocation3], %s1392_s22 }
 0x6c1   : > { %p1649_p7 = pnand %p1652_p4, %p1899_p6 }
 0x6c3   : > { %p1650_p8 = pneg %p1649_p7 }
 0x6c5   : > { %1762 = dma.done.wait (%p1650_p8), %s1393_s28, 128  }
 0x6c6   : > { %1764 = vsyncadd (%p1650_p8), %s1393_s28, 4294967168  ;;  %s2173_s2 = sld [smem:[#allocation5_spill]]  ;;  %p24_p9 = scmp.ge.s32.totalorder %s1882_s19, 4  }
 0x6c7   : > { %s2174_s15 = sld [smem:[#allocation6_spill]]  ;;  %s2175_s29 = smov %s1771_s30 }
 0x6c8   : > { %s2177_s16 = smov %s1882_s19  ;;  %26 = sbr.rel (!%p24_p9) target bundleno = 7 (0x7), region = 111 }
 0x6cc   : > { %s2176_s30 = smov %s2173_s2 }
 0x6cd   :  { %1399 = vsyncpa [#allocation3], 1 }
 0x6ce   :  { %1401 = vsyncpa [#allocation3 + $0x1], 1 }

</bundles_post_ra>
